<compile_context>
chip_gen: v6e
topology: v6e:2x2x1
jax: 0.10.0
libtpu: 0.0.40
codegen_flags: <defaults>
</compile_context>

<pallas_src>
import jax
import jax.numpy as jnp
from jax.experimental import pallas as pl
from jax.experimental.pallas import tpu as pltpu

EPS = 1e-5                      # nn.InstanceNorm2d default eps
# Set to jnp.bfloat16 to feed the MXU bf16 operands (review suggestion for
# v5e/v6e/v7x; f32 accumulation is kept either way).  Default f32 so results
# match the f32 reference bit-for-bit in spirit.
MXU_DTYPE = jnp.float32


def _mm(a, b):
    return jnp.dot(a.astype(MXU_DTYPE), b.astype(MXU_DTYPE),
                   preferred_element_type=jnp.float32)


# ----------------------------------------------------------------------------
# The fused kernel (one sample per grid step).
# ----------------------------------------------------------------------------
def _make_kernel(T, F, C):
    TF = T * F

    def kernel(x_ref, wd0_ref, wd1_ref, wd2_ref, wd3_ref, dvec_ref,
               wp_ref, bp_ref, pvec_ref, wo_ref, bo_ref, o_ref):
        lane = jax.lax.broadcasted_iota(jnp.int32, (1, TF), 1)
        f_ok_lo = (lane % F) >= 1          # a source at f-1 exists
        f_ok_hi = (lane % F) <= F - 2      # a source at f+1 exists

        def tap(x, dt, dfp):
            # y[:, t*F + f] = x[:, (t - dt)*F + (f + dfp)], zero outside the map
            # (implements the ConstantPad2d + conv tap offsets).
            if dt >= T:                    # tap reads only the zero padding
                return jnp.zeros_like(x)
            shift = (dt * F - dfp) % TF    # jnp.roll convention: i -> i + shift
            y = pltpu.roll(x, shift, axis=1) if shift else x
            valid = None
            if dt > 0:
                valid = lane >= dt * F
            if dfp == -1:
                valid = f_ok_lo if valid is None else jnp.logical_and(valid, f_ok_lo)
            elif dfp == 1:
                valid = f_ok_hi if valid is None else jnp.logical_and(valid, f_ok_hi)
            return y if valid is None else jnp.where(valid, y, 0.0)

        def inorm_prelu(y, gamma, beta, alpha):
            # InstanceNorm2d(affine=True) + PReLU, per-channel stats over (T, F).
            mean = jnp.mean(y, axis=1, keepdims=True)
            var = jnp.mean(jnp.square(y - mean), axis=1, keepdims=True)
            y = (y - mean) * jax.lax.rsqrt(var + EPS) * gamma + beta
            return jnp.where(y > 0, y, alpha * y)

        # ------------------- DenseBlock (depth=4, dilation 2**i on T) -------
        wd_refs = (wd0_ref, wd1_ref, wd2_ref, wd3_ref)
        skip = x_ref[0]                                        # (C, T*F)
        y = skip
        for i in range(4):
            dil = 2 ** i
            # in-register im2col: 6 shifted copies stacked along sublanes,
            # then ONE MXU push per layer.
            xt = jnp.concatenate(
                [tap(skip, dil * (1 - kh), kw - 1)
                 for kh in range(2) for kw in range(3)], axis=0)
            y = _mm(wd_refs[i][...], xt) + dvec_ref[:, 4 * i:4 * i + 1]
            y = inorm_prelu(y,
                            dvec_ref[:, 4 * i + 1:4 * i + 2],
                            dvec_ref[:, 4 * i + 2:4 * i + 3],
                            dvec_ref[:, 4 * i + 3:4 * i + 4])
            skip = jnp.concatenate([y, skip], axis=0)          # cat([x, skip], 1)

        # ------- SPConvTranspose2d(C, C, (1,3), r=2) + InstanceNorm + PReLU --
        xt = jnp.concatenate([tap(y, 0, kw - 1) for kw in range(3)], axis=0)
        z = _mm(wp_ref[...], xt) + bp_ref[...]                 # (2C, T*F)
        z0, z1 = z[:C], z[C:]                                  # sub-pixel phases r=0 / r=1
        # InstanceNorm stats over the interleaved (T, 2F) map == both phases.
        mean = (jnp.sum(z0, axis=1, keepdims=True)
                + jnp.sum(z1, axis=1, keepdims=True)) / (2.0 * TF)
        var = (jnp.sum(jnp.square(z0 - mean), axis=1, keepdims=True)
               + jnp.sum(jnp.square(z1 - mean), axis=1, keepdims=True)) / (2.0 * TF)
        scale = jax.lax.rsqrt(var + EPS) * pvec_ref[:, 0:1]
        beta, alpha = pvec_ref[:, 1:2], pvec_ref[:, 2:3]
        z0 = (z0 - mean) * scale + beta
        z1 = (z1 - mean) * scale + beta
        z0 = jnp.where(z0 > 0, z0, alpha * z0)
        z1 = jnp.where(z1 > 0, z1, alpha * z1)

        # ------- phase_conv_r / phase_conv_i : Conv2d(C, 1, (1,2)), fused ----
        # Over the interleaved width w = 2f + r:
        #   even outputs (w=2f)   see taps (z0[f], z1[f])
        #   odd  outputs (w=2f+1) see taps (z1[f], z0[f+1])
        z0n = tap(z0, 0, 1)                                    # z0 advanced one f
        rhs = jnp.concatenate(
            [jnp.concatenate([z0, z1], axis=0),                # even columns
             jnp.concatenate([z1, z0n], axis=0)], axis=1)      # odd columns
        o_ref[0] = _mm(wo_ref[...], rhs) + bo_ref[...]         # (2, 2*T*F): [re; im]

    return kernel


def _fused_phase_decoder(x_flat, params, *, T, F, C):
    """x_flat: (B, C, T*F) -> (B, 2, 2*T*F) pre-atan2 real/imag.
    Columns = [even outputs (w=2f) | odd outputs (w=2f+1)], t-major / f-minor."""
    B = x_flat.shape[0]
    TF = T * F
    wd = params["wd"]
    operands = (x_flat, wd[0], wd[1], wd[2], wd[3], params["dvec"],
                params["wp"], params["bp"], params["pvec"],
                params["wo"], params["bo"])

    def whole(a):  # small shared parameter: single full block, grid-invariant
        return pl.BlockSpec(a.shape, lambda b: (0,) * a.ndim)

    return pl.pallas_call(
        _make_kernel(T, F, C),
        out_shape=jax.ShapeDtypeStruct((B, 2, 2 * TF), jnp.float32),
        grid=(B,),
        in_specs=[pl.BlockSpec((1, C, TF), lambda b: (b, 0, 0))]
                 + [whole(a) for a in operands[1:]],
        out_specs=pl.BlockSpec((1, 2, 2 * TF), lambda b: (b, 0, 0)),
        compiler_params=pltpu.CompilerParams(dimension_semantics=("parallel",)),
    )(*operands)


# ----------------------------------------------------------------------------
# Full forward (PyTorch semantics; x is the module's NCHW input (B, C, T, F)).
# ----------------------------------------------------------------------------
def phase_decoder_forward(x, params, *, return_complex=False):
    B, C, T, F = x.shape
    eo = _fused_phase_decoder(x.reshape(B, C, T * F), params, T=T, F=F, C=C)
    ri = eo.reshape(B, 2, 2, T, F)                     # ({re,im}, parity, T, F)
    # TODO(synk): this ~1 KiB epilogue (atan2 + even/odd interleave + final
    # permute) stays in XLA as one tiny fusion; jnp.arctan2 lowering inside
    # Mosaic is not relied upon.  Everything upstream runs in the fused kernel.
    comp = jnp.moveaxis(ri, 2, -1).reshape(B, 2, T, 2 * F)[..., : 2 * F - 1]
    phase = jnp.arctan2(comp[:, 1], comp[:, 0])        # (B, T, 2F-1)
    out = jnp.transpose(phase, (0, 2, 1))              # == permute(0,3,2,1).squeeze(-1)
    if return_complex:
        return out, comp[:, 0], comp[:, 1]
    return out


# ----------------------------------------------------------------------------
# Pure-XLA (non-Pallas) reference of the PyTorch module, for self-checking.
# ----------------------------------------------------------------------------
def _reference_forward(x, params):
    B, C, T, F = x.shape

    def conv2d(inp, w, b, dil_h=1):
        out = jax.lax.conv_general_dilated(
            inp, w, window_strides=(1, 1), padding="VALID",
            rhs_dilation=(dil_h, 1),
            dimension_numbers=("NCHW", "OIHW", "NCHW"),
            precision=jax.lax.Precision.HIGHEST)
        return out + b.reshape(1, -1, 1, 1)

    def inorm_prelu(v, gamma, beta, alpha):
        mean = jnp.mean(v, axis=(2, 3), keepdims=True)
        var = jnp.mean(jnp.square(v - mean), axis=(2, 3), keepdims=True)
        v = (v - mean) * jax.lax.rsqrt(var + EPS)
        v = v * gamma.reshape(1, -1, 1, 1) + beta.reshape(1, -1, 1, 1)
        return jnp.where(v > 0, v, alpha.reshape(1, -1, 1, 1) * v)

    skip = x
    y = x
    for i in range(4):
        dil = 2 ** i
        cin = C * (i + 1)
        w = params["wd"][i].reshape(C, 2, 3, cin).transpose(0, 3, 1, 2)  # OIHW
        col = params["dvec"][:, 4 * i:4 * i + 4]
        xin = jnp.pad(skip, ((0, 0), (0, 0), (dil, 0), (1, 1)))
        y = conv2d(xin, w, col[:, 0], dil_h=dil)
        y = inorm_prelu(y, col[:, 1], col[:, 2], col[:, 3])
        skip = jnp.concatenate([y, skip], axis=1)

    wp = params["wp"].reshape(2 * C, 3, C).transpose(0, 2, 1)[:, :, None, :]
    out = conv2d(jnp.pad(y, ((0, 0), (0, 0), (0, 0), (1, 1))), wp, params["bp"][:, 0])
    out = (out.reshape(B, 2, C, T, F).transpose(0, 2, 3, 4, 1)
              .reshape(B, C, T, 2 * F))                       # sub-pixel interleave
    out = inorm_prelu(out, params["pvec"][:, 0], params["pvec"][:, 1],
                      params["pvec"][:, 2])

    w_r = params["wo"][0].reshape(2, C).T[None, :, None, :]   # (1, C, 1, 2)
    w_i = params["wo"][1].reshape(2, C).T[None, :, None, :]
    x_r = conv2d(out, w_r, params["bo"][0])[:, 0]             # (B, T, 2F-1)
    x_i = conv2d(out, w_i, params["bo"][1])[:, 0]
    phase = jnp.transpose(jnp.arctan2(x_i, x_r), (0, 2, 1))   # (B, 2F-1, T)
    return phase, x_r, x_i


# ----------------------------------------------------------------------------
# Deterministic parameters, stored in the layouts the fused kernel consumes.
#   wd[i]: (C, 6*C*(i+1))  column (kh*3+kw)*Cin + ci == torch weight[co,ci,kh,kw]
#   dvec : (C, 16)         per layer i cols 4i..4i+3 = [bias, IN gamma, IN beta, PReLU alpha]
#   wp   : (2C, 3C)        column kw*C + ci == torch weight[o,ci,0,kw]; rows 0..C-1 -> r=0
#   bp   : (2C, 1); pvec: (C, 3) = [IN gamma, IN beta, PReLU alpha]
#   wo   : (2, 2C)         row 0 = phase_conv_r, row 1 = phase_conv_i; col kw*C + c
#   bo   : (2, 1)
# ----------------------------------------------------------------------------
def init_params(key, C):
    ks = jax.random.split(key, 12)
    wd, dcols = [], []
    for i in range(4):
        cin = C * (i + 1)
        wd.append(0.1 * jax.random.normal(ks[2 * i], (C, 6 * cin), jnp.float32))
        dcols += [0.1 * jax.random.normal(ks[2 * i + 1], (C,), jnp.float32),
                  jnp.ones((C,), jnp.float32),
                  jnp.zeros((C,), jnp.float32),
                  jnp.full((C,), 0.25, jnp.float32)]
    dvec = jnp.stack(dcols, axis=1)                                   # (C, 16)
    wp = 0.1 * jax.random.normal(ks[8], (2 * C, 3 * C), jnp.float32)
    bp = 0.1 * jax.random.normal(ks[9], (2 * C, 1), jnp.float32)
    pvec = jnp.stack([jnp.ones((C,), jnp.float32),
                      jnp.zeros((C,), jnp.float32),
                      jnp.full((C,), 0.25, jnp.float32)], axis=1)     # (C, 3)
    wo = 0.1 * jax.random.normal(ks[10], (2, 2 * C), jnp.float32)
    bo = 0.1 * jax.random.normal(ks[11], (2, 1), jnp.float32)
    return {"wd": wd, "dvec": dvec, "wp": wp, "bp": bp, "pvec": pvec,
            "wo": wo, "bo": bo}


if __name__ == "__main__":
    key = jax.random.PRNGKey(0)
    B, C, T, F = 2, 8, 8, 16              # h.dense_channel = 8; T*F = 128 lanes
    kx, kp = jax.random.split(key)
    x = jax.random.normal(kx, (B, C, T, F), jnp.float32)   # PyTorch NCHW layout
    params = init_params(kp, C)

    fwd = jax.jit(lambda inp: phase_decoder_forward(inp, params))
    out = fwd(x)
    jax.block_until_ready(out)
    assert out.shape == (B, 2 * F - 1, T), out.shape
    assert out.dtype == jnp.float32

    # Self-check the fused Pallas kernel against the pure-XLA reference of the
    # PyTorch module.  Compared pre-atan2 (well conditioned); the tolerance
    # covers MXU vs HIGHEST-precision XLA matmul differences.
    _, ker_r, ker_i = jax.jit(
        lambda inp: phase_decoder_forward(inp, params, return_complex=True))(x)
    _, ref_r, ref_i = jax.jit(lambda inp: _reference_forward(inp, params))(x)
    scale = float(jnp.maximum(jnp.max(jnp.abs(ref_r)), jnp.max(jnp.abs(ref_i))))
    err = float(jnp.maximum(jnp.max(jnp.abs(ker_r - ref_r)),
                            jnp.max(jnp.abs(ker_i - ref_i))))
    assert err <= 3e-2 * scale + 1e-5, ("kernel/reference mismatch", err, scale)

    print("KERNEL_OK")
</pallas_src>

<mosaic_0001>
module attributes {stable_mosaic.version = 11 : i64} {
  func.func @kernel(%arg0: i32, %arg1: memref<1x8x128xf32, #tpu.memory_space<vmem>>, %arg2: memref<8x48xf32, #tpu.memory_space<vmem>>, %arg3: memref<8x96xf32, #tpu.memory_space<vmem>>, %arg4: memref<8x144xf32, #tpu.memory_space<vmem>>, %arg5: memref<8x192xf32, #tpu.memory_space<vmem>>, %arg6: memref<8x16xf32, #tpu.memory_space<vmem>>, %arg7: memref<16x24xf32, #tpu.memory_space<vmem>>, %arg8: memref<16x1xf32, #tpu.memory_space<vmem>>, %arg9: memref<8x3xf32, #tpu.memory_space<vmem>>, %arg10: memref<2x16xf32, #tpu.memory_space<vmem>>, %arg11: memref<2x1xf32, #tpu.memory_space<vmem>>, %arg12: memref<1x2x256xf32, #tpu.memory_space<vmem>>) attributes {dimension_semantics = [#tpu.dimension_semantics<parallel>], iteration_bounds = array<i64: 2>, scalar_prefetch = 0 : i64, scratch_operands = 0 : i64, tpu.core_type = #tpu.core_type<tc>, window_params = [{transform_indices = @transform_0, window_bounds = array<i64: 1, 8, 128>}, {pipeline_mode = #tpu.pipeline_mode<synchronous>, transform_indices = @transform_1, window_bounds = array<i64: 8, 48>}, {pipeline_mode = #tpu.pipeline_mode<synchronous>, transform_indices = @transform_2, window_bounds = array<i64: 8, 96>}, {pipeline_mode = #tpu.pipeline_mode<synchronous>, transform_indices = @transform_3, window_bounds = array<i64: 8, 144>}, {pipeline_mode = #tpu.pipeline_mode<synchronous>, transform_indices = @transform_4, window_bounds = array<i64: 8, 192>}, {pipeline_mode = #tpu.pipeline_mode<synchronous>, transform_indices = @transform_5, window_bounds = array<i64: 8, 16>}, {pipeline_mode = #tpu.pipeline_mode<synchronous>, transform_indices = @transform_6, window_bounds = array<i64: 16, 24>}, {pipeline_mode = #tpu.pipeline_mode<synchronous>, transform_indices = @transform_7, window_bounds = array<i64: 16, 1>}, {pipeline_mode = #tpu.pipeline_mode<synchronous>, transform_indices = @transform_8, window_bounds = array<i64: 8, 3>}, {pipeline_mode = #tpu.pipeline_mode<synchronous>, transform_indices = @transform_9, window_bounds = array<i64: 2, 16>}, {pipeline_mode = #tpu.pipeline_mode<synchronous>, transform_indices = @transform_10, window_bounds = array<i64: 2, 1>}, {transform_indices = @transform_11, window_bounds = array<i64: 1, 2, 256>}]} {
    %0 = tpu.iota {dimensions = array<i32: 1>} : vector<1x128xi32>
    %c16_i32 = arith.constant 16 : i32
    %c0_i32 = arith.constant 0 : i32
    %1 = arith.cmpi eq, %c16_i32, %c0_i32 : i32
    %c1_i32 = arith.constant 1 : i32
    %2 = arith.select %1, %c1_i32, %c16_i32 : i32
    %3 = vector.broadcast %2 : i32 to vector<1x128xi32>
    %4 = arith.remsi %0, %3 : vector<1x128xi32>
    %c0_i32_0 = arith.constant 0 : i32
    %5 = vector.broadcast %c0_i32_0 : i32 to vector<1x128xi32>
    %6 = arith.cmpi ne, %4, %5 : vector<1x128xi32>
    %c0_i32_1 = arith.constant 0 : i32
    %7 = vector.broadcast %c0_i32_1 : i32 to vector<1x128xi32>
    %8 = arith.cmpi slt, %4, %7 : vector<1x128xi32>
    %c0_i32_2 = arith.constant 0 : i32
    %9 = arith.cmpi slt, %2, %c0_i32_2 : i32
    %10 = vector.broadcast %9 : i1 to vector<1x128xi1>
    %11 = vector.broadcast %10 : vector<1x128xi1> to vector<1x128xi1>
    %12 = arith.xori %8, %11 : vector<1x128xi1>
    %13 = arith.andi %12, %6 : vector<1x128xi1>
    %14 = vector.broadcast %2 : i32 to vector<1x128xi32>
    %15 = arith.addi %4, %14 : vector<1x128xi32>
    %16 = arith.select %13, %15, %4 : vector<1x128xi1>, vector<1x128xi32>
    %c1_i32_3 = arith.constant 1 : i32
    %17 = vector.broadcast %c1_i32_3 : i32 to vector<1x128xi32>
    %18 = arith.cmpi sge, %16, %17 : vector<1x128xi32>
    %c16_i32_4 = arith.constant 16 : i32
    %c0_i32_5 = arith.constant 0 : i32
    %19 = arith.cmpi eq, %c16_i32_4, %c0_i32_5 : i32
    %c1_i32_6 = arith.constant 1 : i32
    %20 = arith.select %19, %c1_i32_6, %c16_i32_4 : i32
    %21 = vector.broadcast %20 : i32 to vector<1x128xi32>
    %22 = arith.remsi %0, %21 : vector<1x128xi32>
    %c0_i32_7 = arith.constant 0 : i32
    %23 = vector.broadcast %c0_i32_7 : i32 to vector<1x128xi32>
    %24 = arith.cmpi ne, %22, %23 : vector<1x128xi32>
    %c0_i32_8 = arith.constant 0 : i32
    %25 = vector.broadcast %c0_i32_8 : i32 to vector<1x128xi32>
    %26 = arith.cmpi slt, %22, %25 : vector<1x128xi32>
    %c0_i32_9 = arith.constant 0 : i32
    %27 = arith.cmpi slt, %20, %c0_i32_9 : i32
    %28 = vector.broadcast %27 : i1 to vector<1x128xi1>
    %29 = vector.broadcast %28 : vector<1x128xi1> to vector<1x128xi1>
    %30 = arith.xori %26, %29 : vector<1x128xi1>
    %31 = arith.andi %30, %24 : vector<1x128xi1>
    %32 = vector.broadcast %20 : i32 to vector<1x128xi32>
    %33 = arith.addi %22, %32 : vector<1x128xi32>
    %34 = arith.select %31, %33, %22 : vector<1x128xi1>, vector<1x128xi32>
    %c14_i32 = arith.constant 14 : i32
    %35 = vector.broadcast %c14_i32 : i32 to vector<1x128xi32>
    %36 = arith.cmpi sle, %34, %35 : vector<1x128xi32>
    %c0 = arith.constant 0 : index
    %c0_10 = arith.constant 0 : index
    %c0_11 = arith.constant 0 : index
    %37 = vector.load %arg1[%c0, %c0_10, %c0_11] : memref<1x8x128xf32, #tpu.memory_space<vmem>>, vector<1x8x128xf32>
    %38 = vector.shape_cast %37 : vector<1x8x128xf32> to vector<8x128xf32>
    %c17_i32 = arith.constant 17 : i32
    %39 = tpu.dynamic_rotate %38 by %c17_i32 dim 1 : vector<8x128xf32>, i32 -> vector<8x128xf32>
    %c16_i32_12 = arith.constant 16 : i32
    %40 = vector.broadcast %c16_i32_12 : i32 to vector<1x128xi32>
    %41 = arith.cmpi sge, %0, %40 : vector<1x128xi32>
    %42 = arith.andi %41, %18 : vector<1x128xi1>
    %cst = arith.constant 0.000000e+00 : f32
    %43 = vector.shape_cast %42 : vector<1x128xi1> to vector<1x128xi1>
    %44 = vector.broadcast %43 : vector<1x128xi1> to vector<8x128xi1>
    %45 = vector.broadcast %cst : f32 to vector<8x128xf32>
    %46 = arith.select %44, %39, %45 : vector<8x128xi1>, vector<8x128xf32>
    %c16_i32_13 = arith.constant 16 : i32
    %47 = tpu.dynamic_rotate %38 by %c16_i32_13 dim 1 : vector<8x128xf32>, i32 -> vector<8x128xf32>
    %c16_i32_14 = arith.constant 16 : i32
    %48 = vector.broadcast %c16_i32_14 : i32 to vector<1x128xi32>
    %49 = arith.cmpi sge, %0, %48 : vector<1x128xi32>
    %cst_15 = arith.constant 0.000000e+00 : f32
    %50 = vector.shape_cast %49 : vector<1x128xi1> to vector<1x128xi1>
    %51 = vector.broadcast %50 : vector<1x128xi1> to vector<8x128xi1>
    %52 = vector.broadcast %cst_15 : f32 to vector<8x128xf32>
    %53 = arith.select %51, %47, %52 : vector<8x128xi1>, vector<8x128xf32>
    %c15_i32 = arith.constant 15 : i32
    %54 = tpu.dynamic_rotate %38 by %c15_i32 dim 1 : vector<8x128xf32>, i32 -> vector<8x128xf32>
    %c16_i32_16 = arith.constant 16 : i32
    %55 = vector.broadcast %c16_i32_16 : i32 to vector<1x128xi32>
    %56 = arith.cmpi sge, %0, %55 : vector<1x128xi32>
    %57 = arith.andi %56, %36 : vector<1x128xi1>
    %cst_17 = arith.constant 0.000000e+00 : f32
    %58 = vector.shape_cast %57 : vector<1x128xi1> to vector<1x128xi1>
    %59 = vector.broadcast %58 : vector<1x128xi1> to vector<8x128xi1>
    %60 = vector.broadcast %cst_17 : f32 to vector<8x128xf32>
    %61 = arith.select %59, %54, %60 : vector<8x128xi1>, vector<8x128xf32>
    %c1_i32_18 = arith.constant 1 : i32
    %62 = tpu.dynamic_rotate %38 by %c1_i32_18 dim 1 : vector<8x128xf32>, i32 -> vector<8x128xf32>
    %cst_19 = arith.constant 0.000000e+00 : f32
    %63 = vector.shape_cast %18 : vector<1x128xi1> to vector<1x128xi1>
    %64 = vector.broadcast %63 : vector<1x128xi1> to vector<8x128xi1>
    %65 = vector.broadcast %cst_19 : f32 to vector<8x128xf32>
    %66 = arith.select %64, %62, %65 : vector<8x128xi1>, vector<8x128xf32>
    %c127_i32 = arith.constant 127 : i32
    %67 = tpu.dynamic_rotate %38 by %c127_i32 dim 1 : vector<8x128xf32>, i32 -> vector<8x128xf32>
    %cst_20 = arith.constant 0.000000e+00 : f32
    %68 = vector.shape_cast %36 : vector<1x128xi1> to vector<1x128xi1>
    %69 = vector.broadcast %68 : vector<1x128xi1> to vector<8x128xi1>
    %70 = vector.broadcast %cst_20 : f32 to vector<8x128xf32>
    %71 = arith.select %69, %67, %70 : vector<8x128xi1>, vector<8x128xf32>
    %72 = tpu.concatenate %46, %53, %61, %66, %38, %71 in 0 : vector<8x128xf32>, vector<8x128xf32>, vector<8x128xf32>, vector<8x128xf32>, vector<8x128xf32>, vector<8x128xf32> -> vector<48x128xf32>
    %c0_21 = arith.constant 0 : index
    %c0_22 = arith.constant 0 : index
    %73 = vector.load %arg2[%c0_21, %c0_22] : memref<8x48xf32, #tpu.memory_space<vmem>>, vector<8x48xf32>
    %cst_23 = arith.constant dense<0.000000e+00> : vector<8x128xf32>
    %74 = tpu.matmul %73, %72, %cst_23 {dimension_numbers = #tpu.dot_dimension_numbers<[1], [0], [0], [1], [0, 0, 1, 1], [], []>} : vector<8x48xf32>, vector<48x128xf32>, vector<8x128xf32> -> vector<8x128xf32>
    %c0_24 = arith.constant 0 : index
    %c0_25 = arith.constant 0 : index
    %75 = vector.load %arg6[%c0_24, %c0_25] : memref<8x16xf32, #tpu.memory_space<vmem>>, vector<8x1xf32>
    %76 = vector.broadcast %75 : vector<8x1xf32> to vector<8x128xf32>
    %77 = arith.addf %74, %76 : vector<8x128xf32>
    %c0_26 = arith.constant 0 : index
    %c1 = arith.constant 1 : index
    %78 = vector.load %arg6[%c0_26, %c1] : memref<8x16xf32, #tpu.memory_space<vmem>>, vector<8x1xf32>
    %c0_27 = arith.constant 0 : index
    %c2 = arith.constant 2 : index
    %79 = vector.load %arg6[%c0_27, %c2] : memref<8x16xf32, #tpu.memory_space<vmem>>, vector<8x1xf32>
    %c0_28 = arith.constant 0 : index
    %c3 = arith.constant 3 : index
    %80 = vector.load %arg6[%c0_28, %c3] : memref<8x16xf32, #tpu.memory_space<vmem>>, vector<8x1xf32>
    %cst_29 = arith.constant dense<0.000000e+00> : vector<8xf32>
    %81 = vector.multi_reduction <add>, %77, %cst_29 [1] : vector<8x128xf32> to vector<8xf32>
    %82 = vector.shape_cast %81 : vector<8xf32> to vector<8x1xf32>
    %cst_30 = arith.constant 1.280000e+02 : f32
    %83 = vector.broadcast %cst_30 : f32 to vector<8x1xf32>
    %84 = arith.divf %82, %83 : vector<8x1xf32>
    %85 = vector.broadcast %84 : vector<8x1xf32> to vector<8x128xf32>
    %86 = arith.subf %77, %85 : vector<8x128xf32>
    %87 = arith.mulf %86, %86 : vector<8x128xf32>
    %cst_31 = arith.constant dense<0.000000e+00> : vector<8xf32>
    %88 = vector.multi_reduction <add>, %87, %cst_31 [1] : vector<8x128xf32> to vector<8xf32>
    %89 = vector.shape_cast %88 : vector<8xf32> to vector<8x1xf32>
    %cst_32 = arith.constant 1.280000e+02 : f32
    %90 = vector.broadcast %cst_32 : f32 to vector<8x1xf32>
    %91 = arith.divf %89, %90 : vector<8x1xf32>
    %92 = vector.broadcast %84 : vector<8x1xf32> to vector<8x128xf32>
    %93 = arith.subf %77, %92 : vector<8x128xf32>
    %cst_33 = arith.constant 9.99999974E-6 : f32
    %94 = vector.broadcast %cst_33 : f32 to vector<8x1xf32>
    %95 = arith.addf %91, %94 : vector<8x1xf32>
    %96 = math.rsqrt %95 : vector<8x1xf32>
    %97 = vector.broadcast %96 : vector<8x1xf32> to vector<8x128xf32>
    %98 = arith.mulf %93, %97 : vector<8x128xf32>
    %99 = vector.broadcast %78 : vector<8x1xf32> to vector<8x128xf32>
    %100 = arith.mulf %98, %99 : vector<8x128xf32>
    %101 = vector.broadcast %79 : vector<8x1xf32> to vector<8x128xf32>
    %102 = arith.addf %100, %101 : vector<8x128xf32>
    %cst_34 = arith.constant 0.000000e+00 : f32
    %103 = vector.broadcast %cst_34 : f32 to vector<8x128xf32>
    %104 = arith.cmpf ogt, %102, %103 : vector<8x128xf32>
    %105 = vector.broadcast %80 : vector<8x1xf32> to vector<8x128xf32>
    %106 = arith.mulf %105, %102 : vector<8x128xf32>
    %107 = arith.select %104, %102, %106 : vector<8x128xi1>, vector<8x128xf32>
    %108 = tpu.concatenate %107, %38 in 0 : vector<8x128xf32>, vector<8x128xf32> -> vector<16x128xf32>
    %c33_i32 = arith.constant 33 : i32
    %109 = tpu.dynamic_rotate %108 by %c33_i32 dim 1 : vector<16x128xf32>, i32 -> vector<16x128xf32>
    %c32_i32 = arith.constant 32 : i32
    %110 = vector.broadcast %c32_i32 : i32 to vector<1x128xi32>
    %111 = arith.cmpi sge, %0, %110 : vector<1x128xi32>
    %112 = arith.andi %111, %18 : vector<1x128xi1>
    %cst_35 = arith.constant 0.000000e+00 : f32
    %113 = vector.shape_cast %112 : vector<1x128xi1> to vector<1x128xi1>
    %114 = vector.broadcast %113 : vector<1x128xi1> to vector<16x128xi1>
    %115 = vector.broadcast %cst_35 : f32 to vector<16x128xf32>
    %116 = arith.select %114, %109, %115 : vector<16x128xi1>, vector<16x128xf32>
    %c32_i32_36 = arith.constant 32 : i32
    %117 = tpu.dynamic_rotate %108 by %c32_i32_36 dim 1 : vector<16x128xf32>, i32 -> vector<16x128xf32>
    %c32_i32_37 = arith.constant 32 : i32
    %118 = vector.broadcast %c32_i32_37 : i32 to vector<1x128xi32>
    %119 = arith.cmpi sge, %0, %118 : vector<1x128xi32>
    %cst_38 = arith.constant 0.000000e+00 : f32
    %120 = vector.shape_cast %119 : vector<1x128xi1> to vector<1x128xi1>
    %121 = vector.broadcast %120 : vector<1x128xi1> to vector<16x128xi1>
    %122 = vector.broadcast %cst_38 : f32 to vector<16x128xf32>
    %123 = arith.select %121, %117, %122 : vector<16x128xi1>, vector<16x128xf32>
    %c31_i32 = arith.constant 31 : i32
    %124 = tpu.dynamic_rotate %108 by %c31_i32 dim 1 : vector<16x128xf32>, i32 -> vector<16x128xf32>
    %c32_i32_39 = arith.constant 32 : i32
    %125 = vector.broadcast %c32_i32_39 : i32 to vector<1x128xi32>
    %126 = arith.cmpi sge, %0, %125 : vector<1x128xi32>
    %127 = arith.andi %126, %36 : vector<1x128xi1>
    %cst_40 = arith.constant 0.000000e+00 : f32
    %128 = vector.shape_cast %127 : vector<1x128xi1> to vector<1x128xi1>
    %129 = vector.broadcast %128 : vector<1x128xi1> to vector<16x128xi1>
    %130 = vector.broadcast %cst_40 : f32 to vector<16x128xf32>
    %131 = arith.select %129, %124, %130 : vector<16x128xi1>, vector<16x128xf32>
    %c1_i32_41 = arith.constant 1 : i32
    %132 = tpu.dynamic_rotate %108 by %c1_i32_41 dim 1 : vector<16x128xf32>, i32 -> vector<16x128xf32>
    %cst_42 = arith.constant 0.000000e+00 : f32
    %133 = vector.shape_cast %18 : vector<1x128xi1> to vector<1x128xi1>
    %134 = vector.broadcast %133 : vector<1x128xi1> to vector<16x128xi1>
    %135 = vector.broadcast %cst_42 : f32 to vector<16x128xf32>
    %136 = arith.select %134, %132, %135 : vector<16x128xi1>, vector<16x128xf32>
    %c127_i32_43 = arith.constant 127 : i32
    %137 = tpu.dynamic_rotate %108 by %c127_i32_43 dim 1 : vector<16x128xf32>, i32 -> vector<16x128xf32>
    %cst_44 = arith.constant 0.000000e+00 : f32
    %138 = vector.shape_cast %36 : vector<1x128xi1> to vector<1x128xi1>
    %139 = vector.broadcast %138 : vector<1x128xi1> to vector<16x128xi1>
    %140 = vector.broadcast %cst_44 : f32 to vector<16x128xf32>
    %141 = arith.select %139, %137, %140 : vector<16x128xi1>, vector<16x128xf32>
    %142 = tpu.concatenate %116, %123, %131, %136, %108, %141 in 0 : vector<16x128xf32>, vector<16x128xf32>, vector<16x128xf32>, vector<16x128xf32>, vector<16x128xf32>, vector<16x128xf32> -> vector<96x128xf32>
    %c0_45 = arith.constant 0 : index
    %c0_46 = arith.constant 0 : index
    %143 = vector.load %arg3[%c0_45, %c0_46] : memref<8x96xf32, #tpu.memory_space<vmem>>, vector<8x96xf32>
    %cst_47 = arith.constant dense<0.000000e+00> : vector<8x128xf32>
    %144 = tpu.matmul %143, %142, %cst_47 {dimension_numbers = #tpu.dot_dimension_numbers<[1], [0], [0], [1], [0, 0, 1, 1], [], []>} : vector<8x96xf32>, vector<96x128xf32>, vector<8x128xf32> -> vector<8x128xf32>
    %c0_48 = arith.constant 0 : index
    %c4 = arith.constant 4 : index
    %145 = vector.load %arg6[%c0_48, %c4] : memref<8x16xf32, #tpu.memory_space<vmem>>, vector<8x1xf32>
    %146 = vector.broadcast %145 : vector<8x1xf32> to vector<8x128xf32>
    %147 = arith.addf %144, %146 : vector<8x128xf32>
    %c0_49 = arith.constant 0 : index
    %c5 = arith.constant 5 : index
    %148 = vector.load %arg6[%c0_49, %c5] : memref<8x16xf32, #tpu.memory_space<vmem>>, vector<8x1xf32>
    %c0_50 = arith.constant 0 : index
    %c6 = arith.constant 6 : index
    %149 = vector.load %arg6[%c0_50, %c6] : memref<8x16xf32, #tpu.memory_space<vmem>>, vector<8x1xf32>
    %c0_51 = arith.constant 0 : index
    %c7 = arith.constant 7 : index
    %150 = vector.load %arg6[%c0_51, %c7] : memref<8x16xf32, #tpu.memory_space<vmem>>, vector<8x1xf32>
    %cst_52 = arith.constant dense<0.000000e+00> : vector<8xf32>
    %151 = vector.multi_reduction <add>, %147, %cst_52 [1] : vector<8x128xf32> to vector<8xf32>
    %152 = vector.shape_cast %151 : vector<8xf32> to vector<8x1xf32>
    %cst_53 = arith.constant 1.280000e+02 : f32
    %153 = vector.broadcast %cst_53 : f32 to vector<8x1xf32>
    %154 = arith.divf %152, %153 : vector<8x1xf32>
    %155 = vector.broadcast %154 : vector<8x1xf32> to vector<8x128xf32>
    %156 = arith.subf %147, %155 : vector<8x128xf32>
    %157 = arith.mulf %156, %156 : vector<8x128xf32>
    %cst_54 = arith.constant dense<0.000000e+00> : vector<8xf32>
    %158 = vector.multi_reduction <add>, %157, %cst_54 [1] : vector<8x128xf32> to vector<8xf32>
    %159 = vector.shape_cast %158 : vector<8xf32> to vector<8x1xf32>
    %cst_55 = arith.constant 1.280000e+02 : f32
    %160 = vector.broadcast %cst_55 : f32 to vector<8x1xf32>
    %161 = arith.divf %159, %160 : vector<8x1xf32>
    %162 = vector.broadcast %154 : vector<8x1xf32> to vector<8x128xf32>
    %163 = arith.subf %147, %162 : vector<8x128xf32>
    %cst_56 = arith.constant 9.99999974E-6 : f32
    %164 = vector.broadcast %cst_56 : f32 to vector<8x1xf32>
    %165 = arith.addf %161, %164 : vector<8x1xf32>
    %166 = math.rsqrt %165 : vector<8x1xf32>
    %167 = vector.broadcast %166 : vector<8x1xf32> to vector<8x128xf32>
    %168 = arith.mulf %163, %167 : vector<8x128xf32>
    %169 = vector.broadcast %148 : vector<8x1xf32> to vector<8x128xf32>
    %170 = arith.mulf %168, %169 : vector<8x128xf32>
    %171 = vector.broadcast %149 : vector<8x1xf32> to vector<8x128xf32>
    %172 = arith.addf %170, %171 : vector<8x128xf32>
    %cst_57 = arith.constant 0.000000e+00 : f32
    %173 = vector.broadcast %cst_57 : f32 to vector<8x128xf32>
    %174 = arith.cmpf ogt, %172, %173 : vector<8x128xf32>
    %175 = vector.broadcast %150 : vector<8x1xf32> to vector<8x128xf32>
    %176 = arith.mulf %175, %172 : vector<8x128xf32>
    %177 = arith.select %174, %172, %176 : vector<8x128xi1>, vector<8x128xf32>
    %178 = tpu.concatenate %177, %108 in 0 : vector<8x128xf32>, vector<16x128xf32> -> vector<24x128xf32>
    %c65_i32 = arith.constant 65 : i32
    %179 = tpu.dynamic_rotate %178 by %c65_i32 dim 1 : vector<24x128xf32>, i32 -> vector<24x128xf32>
    %c64_i32 = arith.constant 64 : i32
    %180 = vector.broadcast %c64_i32 : i32 to vector<1x128xi32>
    %181 = arith.cmpi sge, %0, %180 : vector<1x128xi32>
    %182 = arith.andi %181, %18 : vector<1x128xi1>
    %cst_58 = arith.constant 0.000000e+00 : f32
    %183 = vector.shape_cast %182 : vector<1x128xi1> to vector<1x128xi1>
    %184 = vector.broadcast %183 : vector<1x128xi1> to vector<24x128xi1>
    %185 = vector.broadcast %cst_58 : f32 to vector<24x128xf32>
    %186 = arith.select %184, %179, %185 : vector<24x128xi1>, vector<24x128xf32>
    %c64_i32_59 = arith.constant 64 : i32
    %187 = tpu.dynamic_rotate %178 by %c64_i32_59 dim 1 : vector<24x128xf32>, i32 -> vector<24x128xf32>
    %c64_i32_60 = arith.constant 64 : i32
    %188 = vector.broadcast %c64_i32_60 : i32 to vector<1x128xi32>
    %189 = arith.cmpi sge, %0, %188 : vector<1x128xi32>
    %cst_61 = arith.constant 0.000000e+00 : f32
    %190 = vector.shape_cast %189 : vector<1x128xi1> to vector<1x128xi1>
    %191 = vector.broadcast %190 : vector<1x128xi1> to vector<24x128xi1>
    %192 = vector.broadcast %cst_61 : f32 to vector<24x128xf32>
    %193 = arith.select %191, %187, %192 : vector<24x128xi1>, vector<24x128xf32>
    %c63_i32 = arith.constant 63 : i32
    %194 = tpu.dynamic_rotate %178 by %c63_i32 dim 1 : vector<24x128xf32>, i32 -> vector<24x128xf32>
    %c64_i32_62 = arith.constant 64 : i32
    %195 = vector.broadcast %c64_i32_62 : i32 to vector<1x128xi32>
    %196 = arith.cmpi sge, %0, %195 : vector<1x128xi32>
    %197 = arith.andi %196, %36 : vector<1x128xi1>
    %cst_63 = arith.constant 0.000000e+00 : f32
    %198 = vector.shape_cast %197 : vector<1x128xi1> to vector<1x128xi1>
    %199 = vector.broadcast %198 : vector<1x128xi1> to vector<24x128xi1>
    %200 = vector.broadcast %cst_63 : f32 to vector<24x128xf32>
    %201 = arith.select %199, %194, %200 : vector<24x128xi1>, vector<24x128xf32>
    %c1_i32_64 = arith.constant 1 : i32
    %202 = tpu.dynamic_rotate %178 by %c1_i32_64 dim 1 : vector<24x128xf32>, i32 -> vector<24x128xf32>
    %cst_65 = arith.constant 0.000000e+00 : f32
    %203 = vector.shape_cast %18 : vector<1x128xi1> to vector<1x128xi1>
    %204 = vector.broadcast %203 : vector<1x128xi1> to vector<24x128xi1>
    %205 = vector.broadcast %cst_65 : f32 to vector<24x128xf32>
    %206 = arith.select %204, %202, %205 : vector<24x128xi1>, vector<24x128xf32>
    %c127_i32_66 = arith.constant 127 : i32
    %207 = tpu.dynamic_rotate %178 by %c127_i32_66 dim 1 : vector<24x128xf32>, i32 -> vector<24x128xf32>
    %cst_67 = arith.constant 0.000000e+00 : f32
    %208 = vector.shape_cast %36 : vector<1x128xi1> to vector<1x128xi1>
    %209 = vector.broadcast %208 : vector<1x128xi1> to vector<24x128xi1>
    %210 = vector.broadcast %cst_67 : f32 to vector<24x128xf32>
    %211 = arith.select %209, %207, %210 : vector<24x128xi1>, vector<24x128xf32>
    %212 = tpu.concatenate %186, %193, %201, %206, %178, %211 in 0 : vector<24x128xf32>, vector<24x128xf32>, vector<24x128xf32>, vector<24x128xf32>, vector<24x128xf32>, vector<24x128xf32> -> vector<144x128xf32>
    %c0_68 = arith.constant 0 : index
    %c0_69 = arith.constant 0 : index
    %213 = vector.load %arg4[%c0_68, %c0_69] : memref<8x144xf32, #tpu.memory_space<vmem>>, vector<8x144xf32>
    %cst_70 = arith.constant dense<0.000000e+00> : vector<8x128xf32>
    %214 = tpu.matmul %213, %212, %cst_70 {dimension_numbers = #tpu.dot_dimension_numbers<[1], [0], [0], [1], [0, 0, 1, 1], [], []>} : vector<8x144xf32>, vector<144x128xf32>, vector<8x128xf32> -> vector<8x128xf32>
    %c0_71 = arith.constant 0 : index
    %c8 = arith.constant 8 : index
    %215 = vector.load %arg6[%c0_71, %c8] : memref<8x16xf32, #tpu.memory_space<vmem>>, vector<8x1xf32>
    %216 = vector.broadcast %215 : vector<8x1xf32> to vector<8x128xf32>
    %217 = arith.addf %214, %216 : vector<8x128xf32>
    %c0_72 = arith.constant 0 : index
    %c9 = arith.constant 9 : index
    %218 = vector.load %arg6[%c0_72, %c9] : memref<8x16xf32, #tpu.memory_space<vmem>>, vector<8x1xf32>
    %c0_73 = arith.constant 0 : index
    %c10 = arith.constant 10 : index
    %219 = vector.load %arg6[%c0_73, %c10] : memref<8x16xf32, #tpu.memory_space<vmem>>, vector<8x1xf32>
    %c0_74 = arith.constant 0 : index
    %c11 = arith.constant 11 : index
    %220 = vector.load %arg6[%c0_74, %c11] : memref<8x16xf32, #tpu.memory_space<vmem>>, vector<8x1xf32>
    %cst_75 = arith.constant dense<0.000000e+00> : vector<8xf32>
    %221 = vector.multi_reduction <add>, %217, %cst_75 [1] : vector<8x128xf32> to vector<8xf32>
    %222 = vector.shape_cast %221 : vector<8xf32> to vector<8x1xf32>
    %cst_76 = arith.constant 1.280000e+02 : f32
    %223 = vector.broadcast %cst_76 : f32 to vector<8x1xf32>
    %224 = arith.divf %222, %223 : vector<8x1xf32>
    %225 = vector.broadcast %224 : vector<8x1xf32> to vector<8x128xf32>
    %226 = arith.subf %217, %225 : vector<8x128xf32>
    %227 = arith.mulf %226, %226 : vector<8x128xf32>
    %cst_77 = arith.constant dense<0.000000e+00> : vector<8xf32>
    %228 = vector.multi_reduction <add>, %227, %cst_77 [1] : vector<8x128xf32> to vector<8xf32>
    %229 = vector.shape_cast %228 : vector<8xf32> to vector<8x1xf32>
    %cst_78 = arith.constant 1.280000e+02 : f32
    %230 = vector.broadcast %cst_78 : f32 to vector<8x1xf32>
    %231 = arith.divf %229, %230 : vector<8x1xf32>
    %232 = vector.broadcast %224 : vector<8x1xf32> to vector<8x128xf32>
    %233 = arith.subf %217, %232 : vector<8x128xf32>
    %cst_79 = arith.constant 9.99999974E-6 : f32
    %234 = vector.broadcast %cst_79 : f32 to vector<8x1xf32>
    %235 = arith.addf %231, %234 : vector<8x1xf32>
    %236 = math.rsqrt %235 : vector<8x1xf32>
    %237 = vector.broadcast %236 : vector<8x1xf32> to vector<8x128xf32>
    %238 = arith.mulf %233, %237 : vector<8x128xf32>
    %239 = vector.broadcast %218 : vector<8x1xf32> to vector<8x128xf32>
    %240 = arith.mulf %238, %239 : vector<8x128xf32>
    %241 = vector.broadcast %219 : vector<8x1xf32> to vector<8x128xf32>
    %242 = arith.addf %240, %241 : vector<8x128xf32>
    %cst_80 = arith.constant 0.000000e+00 : f32
    %243 = vector.broadcast %cst_80 : f32 to vector<8x128xf32>
    %244 = arith.cmpf ogt, %242, %243 : vector<8x128xf32>
    %245 = vector.broadcast %220 : vector<8x1xf32> to vector<8x128xf32>
    %246 = arith.mulf %245, %242 : vector<8x128xf32>
    %247 = arith.select %244, %242, %246 : vector<8x128xi1>, vector<8x128xf32>
    %248 = tpu.concatenate %247, %178 in 0 : vector<8x128xf32>, vector<24x128xf32> -> vector<32x128xf32>
    %cst_81 = arith.constant 0.000000e+00 : f32
    %249 = vector.broadcast %cst_81 : f32 to vector<32x128xf32>
    %cst_82 = arith.constant 0.000000e+00 : f32
    %250 = vector.broadcast %cst_82 : f32 to vector<32x128xf32>
    %cst_83 = arith.constant 0.000000e+00 : f32
    %251 = vector.broadcast %cst_83 : f32 to vector<32x128xf32>
    %c1_i32_84 = arith.constant 1 : i32
    %252 = tpu.dynamic_rotate %248 by %c1_i32_84 dim 1 : vector<32x128xf32>, i32 -> vector<32x128xf32>
    %cst_85 = arith.constant 0.000000e+00 : f32
    %253 = vector.shape_cast %18 : vector<1x128xi1> to vector<1x128xi1>
    %254 = vector.broadcast %253 : vector<1x128xi1> to vector<32x128xi1>
    %255 = vector.broadcast %cst_85 : f32 to vector<32x128xf32>
    %256 = arith.select %254, %252, %255 : vector<32x128xi1>, vector<32x128xf32>
    %c127_i32_86 = arith.constant 127 : i32
    %257 = tpu.dynamic_rotate %248 by %c127_i32_86 dim 1 : vector<32x128xf32>, i32 -> vector<32x128xf32>
    %cst_87 = arith.constant 0.000000e+00 : f32
    %258 = vector.shape_cast %36 : vector<1x128xi1> to vector<1x128xi1>
    %259 = vector.broadcast %258 : vector<1x128xi1> to vector<32x128xi1>
    %260 = vector.broadcast %cst_87 : f32 to vector<32x128xf32>
    %261 = arith.select %259, %257, %260 : vector<32x128xi1>, vector<32x128xf32>
    %262 = tpu.concatenate %249, %250, %251, %256, %248, %261 in 0 : vector<32x128xf32>, vector<32x128xf32>, vector<32x128xf32>, vector<32x128xf32>, vector<32x128xf32>, vector<32x128xf32> -> vector<192x128xf32>
    %c0_88 = arith.constant 0 : index
    %c0_89 = arith.constant 0 : index
    %263 = vector.load %arg5[%c0_88, %c0_89] : memref<8x192xf32, #tpu.memory_space<vmem>>, vector<8x192xf32>
    %cst_90 = arith.constant dense<0.000000e+00> : vector<8x128xf32>
    %264 = tpu.matmul %263, %262, %cst_90 {dimension_numbers = #tpu.dot_dimension_numbers<[1], [0], [0], [1], [0, 0, 1, 1], [], []>} : vector<8x192xf32>, vector<192x128xf32>, vector<8x128xf32> -> vector<8x128xf32>
    %c0_91 = arith.constant 0 : index
    %c12 = arith.constant 12 : index
    %265 = vector.load %arg6[%c0_91, %c12] : memref<8x16xf32, #tpu.memory_space<vmem>>, vector<8x1xf32>
    %266 = vector.broadcast %265 : vector<8x1xf32> to vector<8x128xf32>
    %267 = arith.addf %264, %266 : vector<8x128xf32>
    %c0_92 = arith.constant 0 : index
    %c13 = arith.constant 13 : index
    %268 = vector.load %arg6[%c0_92, %c13] : memref<8x16xf32, #tpu.memory_space<vmem>>, vector<8x1xf32>
    %c0_93 = arith.constant 0 : index
    %c14 = arith.constant 14 : index
    %269 = vector.load %arg6[%c0_93, %c14] : memref<8x16xf32, #tpu.memory_space<vmem>>, vector<8x1xf32>
    %c0_94 = arith.constant 0 : index
    %c15 = arith.constant 15 : index
    %270 = vector.load %arg6[%c0_94, %c15] : memref<8x16xf32, #tpu.memory_space<vmem>>, vector<8x1xf32>
    %cst_95 = arith.constant dense<0.000000e+00> : vector<8xf32>
    %271 = vector.multi_reduction <add>, %267, %cst_95 [1] : vector<8x128xf32> to vector<8xf32>
    %272 = vector.shape_cast %271 : vector<8xf32> to vector<8x1xf32>
    %cst_96 = arith.constant 1.280000e+02 : f32
    %273 = vector.broadcast %cst_96 : f32 to vector<8x1xf32>
    %274 = arith.divf %272, %273 : vector<8x1xf32>
    %275 = vector.broadcast %274 : vector<8x1xf32> to vector<8x128xf32>
    %276 = arith.subf %267, %275 : vector<8x128xf32>
    %277 = arith.mulf %276, %276 : vector<8x128xf32>
    %cst_97 = arith.constant dense<0.000000e+00> : vector<8xf32>
    %278 = vector.multi_reduction <add>, %277, %cst_97 [1] : vector<8x128xf32> to vector<8xf32>
    %279 = vector.shape_cast %278 : vector<8xf32> to vector<8x1xf32>
    %cst_98 = arith.constant 1.280000e+02 : f32
    %280 = vector.broadcast %cst_98 : f32 to vector<8x1xf32>
    %281 = arith.divf %279, %280 : vector<8x1xf32>
    %282 = vector.broadcast %274 : vector<8x1xf32> to vector<8x128xf32>
    %283 = arith.subf %267, %282 : vector<8x128xf32>
    %cst_99 = arith.constant 9.99999974E-6 : f32
    %284 = vector.broadcast %cst_99 : f32 to vector<8x1xf32>
    %285 = arith.addf %281, %284 : vector<8x1xf32>
    %286 = math.rsqrt %285 : vector<8x1xf32>
    %287 = vector.broadcast %286 : vector<8x1xf32> to vector<8x128xf32>
    %288 = arith.mulf %283, %287 : vector<8x128xf32>
    %289 = vector.broadcast %268 : vector<8x1xf32> to vector<8x128xf32>
    %290 = arith.mulf %288, %289 : vector<8x128xf32>
    %291 = vector.broadcast %269 : vector<8x1xf32> to vector<8x128xf32>
    %292 = arith.addf %290, %291 : vector<8x128xf32>
    %cst_100 = arith.constant 0.000000e+00 : f32
    %293 = vector.broadcast %cst_100 : f32 to vector<8x128xf32>
    %294 = arith.cmpf ogt, %292, %293 : vector<8x128xf32>
    %295 = vector.broadcast %270 : vector<8x1xf32> to vector<8x128xf32>
    %296 = arith.mulf %295, %292 : vector<8x128xf32>
    %297 = arith.select %294, %292, %296 : vector<8x128xi1>, vector<8x128xf32>
    %c1_i32_101 = arith.constant 1 : i32
    %298 = tpu.dynamic_rotate %297 by %c1_i32_101 dim 1 : vector<8x128xf32>, i32 -> vector<8x128xf32>
    %cst_102 = arith.constant 0.000000e+00 : f32
    %299 = vector.shape_cast %18 : vector<1x128xi1> to vector<1x128xi1>
    %300 = vector.broadcast %299 : vector<1x128xi1> to vector<8x128xi1>
    %301 = vector.broadcast %cst_102 : f32 to vector<8x128xf32>
    %302 = arith.select %300, %298, %301 : vector<8x128xi1>, vector<8x128xf32>
    %c127_i32_103 = arith.constant 127 : i32
    %303 = tpu.dynamic_rotate %297 by %c127_i32_103 dim 1 : vector<8x128xf32>, i32 -> vector<8x128xf32>
    %cst_104 = arith.constant 0.000000e+00 : f32
    %304 = vector.shape_cast %36 : vector<1x128xi1> to vector<1x128xi1>
    %305 = vector.broadcast %304 : vector<1x128xi1> to vector<8x128xi1>
    %306 = vector.broadcast %cst_104 : f32 to vector<8x128xf32>
    %307 = arith.select %305, %303, %306 : vector<8x128xi1>, vector<8x128xf32>
    %308 = tpu.concatenate %302, %297, %307 in 0 : vector<8x128xf32>, vector<8x128xf32>, vector<8x128xf32> -> vector<24x128xf32>
    %c0_105 = arith.constant 0 : index
    %c0_106 = arith.constant 0 : index
    %309 = vector.load %arg7[%c0_105, %c0_106] : memref<16x24xf32, #tpu.memory_space<vmem>>, vector<16x24xf32>
    %cst_107 = arith.constant dense<0.000000e+00> : vector<16x128xf32>
    %310 = tpu.matmul %309, %308, %cst_107 {dimension_numbers = #tpu.dot_dimension_numbers<[1], [0], [0], [1], [0, 0, 1, 1], [], []>} : vector<16x24xf32>, vector<24x128xf32>, vector<16x128xf32> -> vector<16x128xf32>
    %c0_108 = arith.constant 0 : index
    %c0_109 = arith.constant 0 : index
    %311 = vector.load %arg8[%c0_108, %c0_109] : memref<16x1xf32, #tpu.memory_space<vmem>>, vector<16x1xf32>
    %312 = vector.broadcast %311 : vector<16x1xf32> to vector<16x128xf32>
    %313 = arith.addf %310, %312 : vector<16x128xf32>
    %314 = vector.extract_strided_slice %313 {offsets = [0, 0], sizes = [8, 128], strides = [1, 1]} : vector<16x128xf32> to vector<8x128xf32>
    %315 = vector.extract_strided_slice %313 {offsets = [8, 0], sizes = [8, 128], strides = [1, 1]} : vector<16x128xf32> to vector<8x128xf32>
    %cst_110 = arith.constant dense<0.000000e+00> : vector<8xf32>
    %316 = vector.multi_reduction <add>, %314, %cst_110 [1] : vector<8x128xf32> to vector<8xf32>
    %317 = vector.shape_cast %316 : vector<8xf32> to vector<8x1xf32>
    %cst_111 = arith.constant dense<0.000000e+00> : vector<8xf32>
    %318 = vector.multi_reduction <add>, %315, %cst_111 [1] : vector<8x128xf32> to vector<8xf32>
    %319 = vector.shape_cast %318 : vector<8xf32> to vector<8x1xf32>
    %320 = arith.addf %317, %319 : vector<8x1xf32>
    %cst_112 = arith.constant 2.560000e+02 : f32
    %321 = vector.broadcast %cst_112 : f32 to vector<8x1xf32>
    %322 = arith.divf %320, %321 : vector<8x1xf32>
    %323 = vector.broadcast %322 : vector<8x1xf32> to vector<8x128xf32>
    %324 = arith.subf %314, %323 : vector<8x128xf32>
    %325 = arith.mulf %324, %324 : vector<8x128xf32>
    %cst_113 = arith.constant dense<0.000000e+00> : vector<8xf32>
    %326 = vector.multi_reduction <add>, %325, %cst_113 [1] : vector<8x128xf32> to vector<8xf32>
    %327 = vector.shape_cast %326 : vector<8xf32> to vector<8x1xf32>
    %328 = vector.broadcast %322 : vector<8x1xf32> to vector<8x128xf32>
    %329 = arith.subf %315, %328 : vector<8x128xf32>
    %330 = arith.mulf %329, %329 : vector<8x128xf32>
    %cst_114 = arith.constant dense<0.000000e+00> : vector<8xf32>
    %331 = vector.multi_reduction <add>, %330, %cst_114 [1] : vector<8x128xf32> to vector<8xf32>
    %332 = vector.shape_cast %331 : vector<8xf32> to vector<8x1xf32>
    %333 = arith.addf %327, %332 : vector<8x1xf32>
    %cst_115 = arith.constant 2.560000e+02 : f32
    %334 = vector.broadcast %cst_115 : f32 to vector<8x1xf32>
    %335 = arith.divf %333, %334 : vector<8x1xf32>
    %cst_116 = arith.constant 9.99999974E-6 : f32
    %336 = vector.broadcast %cst_116 : f32 to vector<8x1xf32>
    %337 = arith.addf %335, %336 : vector<8x1xf32>
    %338 = math.rsqrt %337 : vector<8x1xf32>
    %c0_117 = arith.constant 0 : index
    %c0_118 = arith.constant 0 : index
    %339 = vector.load %arg9[%c0_117, %c0_118] : memref<8x3xf32, #tpu.memory_space<vmem>>, vector<8x1xf32>
    %340 = arith.mulf %338, %339 : vector<8x1xf32>
    %c0_119 = arith.constant 0 : index
    %c1_120 = arith.constant 1 : index
    %341 = vector.load %arg9[%c0_119, %c1_120] : memref<8x3xf32, #tpu.memory_space<vmem>>, vector<8x1xf32>
    %c0_121 = arith.constant 0 : index
    %c2_122 = arith.constant 2 : index
    %342 = vector.load %arg9[%c0_121, %c2_122] : memref<8x3xf32, #tpu.memory_space<vmem>>, vector<8x1xf32>
    %343 = vector.broadcast %322 : vector<8x1xf32> to vector<8x128xf32>
    %344 = arith.subf %314, %343 : vector<8x128xf32>
    %345 = vector.broadcast %340 : vector<8x1xf32> to vector<8x128xf32>
    %346 = arith.mulf %344, %345 : vector<8x128xf32>
    %347 = vector.broadcast %341 : vector<8x1xf32> to vector<8x128xf32>
    %348 = arith.addf %346, %347 : vector<8x128xf32>
    %349 = vector.broadcast %322 : vector<8x1xf32> to vector<8x128xf32>
    %350 = arith.subf %315, %349 : vector<8x128xf32>
    %351 = vector.broadcast %340 : vector<8x1xf32> to vector<8x128xf32>
    %352 = arith.mulf %350, %351 : vector<8x128xf32>
    %353 = vector.broadcast %341 : vector<8x1xf32> to vector<8x128xf32>
    %354 = arith.addf %352, %353 : vector<8x128xf32>
    %cst_123 = arith.constant 0.000000e+00 : f32
    %355 = vector.broadcast %cst_123 : f32 to vector<8x128xf32>
    %356 = arith.cmpf ogt, %348, %355 : vector<8x128xf32>
    %357 = vector.broadcast %342 : vector<8x1xf32> to vector<8x128xf32>
    %358 = arith.mulf %357, %348 : vector<8x128xf32>
    %359 = arith.select %356, %348, %358 : vector<8x128xi1>, vector<8x128xf32>
    %cst_124 = arith.constant 0.000000e+00 : f32
    %360 = vector.broadcast %cst_124 : f32 to vector<8x128xf32>
    %361 = arith.cmpf ogt, %354, %360 : vector<8x128xf32>
    %362 = vector.broadcast %342 : vector<8x1xf32> to vector<8x128xf32>
    %363 = arith.mulf %362, %354 : vector<8x128xf32>
    %364 = arith.select %361, %354, %363 : vector<8x128xi1>, vector<8x128xf32>
    %c127_i32_125 = arith.constant 127 : i32
    %365 = tpu.dynamic_rotate %359 by %c127_i32_125 dim 1 : vector<8x128xf32>, i32 -> vector<8x128xf32>
    %cst_126 = arith.constant 0.000000e+00 : f32
    %366 = vector.shape_cast %36 : vector<1x128xi1> to vector<1x128xi1>
    %367 = vector.broadcast %366 : vector<1x128xi1> to vector<8x128xi1>
    %368 = vector.broadcast %cst_126 : f32 to vector<8x128xf32>
    %369 = arith.select %367, %365, %368 : vector<8x128xi1>, vector<8x128xf32>
    %370 = tpu.concatenate %359, %364 in 0 : vector<8x128xf32>, vector<8x128xf32> -> vector<16x128xf32>
    %371 = tpu.concatenate %364, %369 in 0 : vector<8x128xf32>, vector<8x128xf32> -> vector<16x128xf32>
    %372 = tpu.concatenate %370, %371 in 1 : vector<16x128xf32>, vector<16x128xf32> -> vector<16x256xf32>
    %c0_127 = arith.constant 0 : index
    %c0_128 = arith.constant 0 : index
    %373 = vector.load %arg10[%c0_127, %c0_128] : memref<2x16xf32, #tpu.memory_space<vmem>>, vector<2x16xf32>
    %cst_129 = arith.constant dense<0.000000e+00> : vector<2x256xf32>
    %374 = tpu.matmul %373, %372, %cst_129 {dimension_numbers = #tpu.dot_dimension_numbers<[1], [0], [0], [1], [0, 0, 1, 1], [], []>} : vector<2x16xf32>, vector<16x256xf32>, vector<2x256xf32> -> vector<2x256xf32>
    %c0_130 = arith.constant 0 : index
    %c0_131 = arith.constant 0 : index
    %375 = vector.load %arg11[%c0_130, %c0_131] : memref<2x1xf32, #tpu.memory_space<vmem>>, vector<2x1xf32>
    %376 = vector.broadcast %375 : vector<2x1xf32> to vector<2x256xf32>
    %377 = arith.addf %374, %376 : vector<2x256xf32>
    %c0_132 = arith.constant 0 : index
    %c0_133 = arith.constant 0 : index
    %c0_134 = arith.constant 0 : index
    %378 = vector.load %arg12[%c0_132, %c0_133, %c0_134] : memref<1x2x256xf32, #tpu.memory_space<vmem>>, vector<1x2x256xf32>
    %379 = vector.shape_cast %378 : vector<1x2x256xf32> to vector<2x256xf32>
    %380 = vector.shape_cast %377 : vector<2x256xf32> to vector<1x2x256xf32>
    tpu.vector_store %arg12[%c0_132, %c0_133, %c0_134], %380 {strides = array<i32>} : memref<1x2x256xf32, #tpu.memory_space<vmem>>, vector<1x2x256xf32>,
    return
  }
  func.func @transform_0(%arg0: i32) -> (i32, i32, i32) {
    %c0_i32 = arith.constant 0 : i32
    %c0_i32_0 = arith.constant 0 : i32
    %c0_i32_1 = arith.constant 0 : i32
    return %arg0, %c0_i32, %c0_i32_0 : i32, i32, i32
  }
  func.func @transform_1(%arg0: i32) -> (i32, i32) {
    %c0_i32 = arith.constant 0 : i32
    %c0_i32_0 = arith.constant 0 : i32
    %c0_i32_1 = arith.constant 0 : i32
    return %c0_i32, %c0_i32_0 : i32, i32
  }
  func.func @transform_2(%arg0: i32) -> (i32, i32) {
    %c0_i32 = arith.constant 0 : i32
    %c0_i32_0 = arith.constant 0 : i32
    %c0_i32_1 = arith.constant 0 : i32
    return %c0_i32, %c0_i32_0 : i32, i32
  }
  func.func @transform_3(%arg0: i32) -> (i32, i32) {
    %c0_i32 = arith.constant 0 : i32
    %c0_i32_0 = arith.constant 0 : i32
    %c0_i32_1 = arith.constant 0 : i32
    return %c0_i32, %c0_i32_0 : i32, i32
  }
  func.func @transform_4(%arg0: i32) -> (i32, i32) {
    %c0_i32 = arith.constant 0 : i32
    %c0_i32_0 = arith.constant 0 : i32
    %c0_i32_1 = arith.constant 0 : i32
    return %c0_i32, %c0_i32_0 : i32, i32
  }
  func.func @transform_5(%arg0: i32) -> (i32, i32) {
    %c0_i32 = arith.constant 0 : i32
    %c0_i32_0 = arith.constant 0 : i32
    %c0_i32_1 = arith.constant 0 : i32
    return %c0_i32, %c0_i32_0 : i32, i32
  }
  func.func @transform_6(%arg0: i32) -> (i32, i32) {
    %c0_i32 = arith.constant 0 : i32
    %c0_i32_0 = arith.constant 0 : i32
    %c0_i32_1 = arith.constant 0 : i32
    return %c0_i32, %c0_i32_0 : i32, i32
  }
  func.func @transform_7(%arg0: i32) -> (i32, i32) {
    %c0_i32 = arith.constant 0 : i32
    %c0_i32_0 = arith.constant 0 : i32
    %c0_i32_1 = arith.constant 0 : i32
    return %c0_i32, %c0_i32_0 : i32, i32
  }
  func.func @transform_8(%arg0: i32) -> (i32, i32) {
    %c0_i32 = arith.constant 0 : i32
    %c0_i32_0 = arith.constant 0 : i32
    %c0_i32_1 = arith.constant 0 : i32
    return %c0_i32, %c0_i32_0 : i32, i32
  }
  func.func @transform_9(%arg0: i32) -> (i32, i32) {
    %c0_i32 = arith.constant 0 : i32
    %c0_i32_0 = arith.constant 0 : i32
    %c0_i32_1 = arith.constant 0 : i32
    return %c0_i32, %c0_i32_0 : i32, i32
  }
  func.func @transform_10(%arg0: i32) -> (i32, i32) {
    %c0_i32 = arith.constant 0 : i32
    %c0_i32_0 = arith.constant 0 : i32
    %c0_i32_1 = arith.constant 0 : i32
    return %c0_i32, %c0_i32_0 : i32, i32
  }
  func.func @transform_11(%arg0: i32) -> (i32, i32, i32) {
    %c0_i32 = arith.constant 0 : i32
    %c0_i32_0 = arith.constant 0 : i32
    %c0_i32_1 = arith.constant 0 : i32
    return %arg0, %c0_i32, %c0_i32_0 : i32, i32, i32
  }
}

</mosaic_0001>

<bundles_post_ra>
// kernel: _lambda_.1
= control target key start
LH: loop header
LB: loop body
LE: loop exit
PB: predicated region body
PF: predicated region fallthrough
CT: control target
= control target key end

     0   :  { %s1542_s17 = smov 0   ;;  %s1880_s0 = inlined_call_operand.vmem [shape: f32[2,8,128], index: 0, kind: input, shape index: {}]   ;;  %s1881_s1 = inlined_call_operand.vmem [shape: f32[8,48], index: 1, kind: input, shape index: {}]   ;;  %s1882_s2 = inlined_call_operand.vmem [shape: f32[8,96], index: 2, kind: input, shape index: {}]   ;;  %s1883_s3 = inlined_call_operand.vmem [shape: f32[8,144], index: 3, kind: input, shape index: {}]   ;;  %s1884_s4 = inlined_call_operand.vmem [shape: f32[8,192], index: 4, kind: input, shape index: {}]   ;;  %s1885_s5 = inlined_call_operand.vmem [shape: f32[8,16], index: 5, kind: input, shape index: {}]   ;;  %s1886_s6 = inlined_call_operand.vmem [shape: f32[16,24], index: 6, kind: input, shape index: {}]   ;;  %s1887_s7 = inlined_call_operand.vmem [shape: f32[16,1], index: 7, kind: input, shape index: {}]   ;;  %s1888_s8 = inlined_call_operand.vmem [shape: f32[8,3], index: 8, kind: input, shape index: {}]   ;;  %s1889_s9 = inlined_call_operand.vmem [shape: f32[2,16], index: 9, kind: input, shape index: {}]   ;;  %s1890_s10 = inlined_call_operand.vmem [shape: f32[2,1], index: 10, kind: input, shape index: {}]   ;;  %s1891_s11 = inlined_call_operand.vmem [shape: f32[2,2,256], index: 11, kind: output, shape index: {}]  }
   0x1 LB: > { %s1241_s18 = sadd.s32 4294967295, %s1451_s17   ;;  %p1245_p0 = scmp.ge.s32.totalorder %s1451_s17, 1  ;;  %s1451_s17 = sphi %s1542_s17, %s21_s17  }
   0x2   : > { %p336_p1 = scmp.lt.s32.totalorder %s1451_s17, 3 }
   0x4   : > { %p337_p2 = pnand %p1245_p0, %p336_p1 }
   0x5   : > { %p375_p3 = scmp.lt.s32.totalorder (!%p337_p2), %s1241_s18, 1  ;;  %s1456_s23 = smov (!%p337_p2), 127  }
   0x6   : > { %340 = sbr.rel (%p337_p2) target bundleno = 3676 (0xe5c), region = 64  ;;  %s1457_s24 = smov (!%p337_p2), 15  }
   0x7   : > { %s1458_s25 = smov (!%p337_p2), 1   ;;  %s1459_s26 = smov (!%p337_p2), 16  }
   0x8   : > { %s1460_s29 = smov (!%p337_p2), 17   ;;  %s1464_s13 = smov (!%p337_p2), 32  }
   0x9   : > { %s1465_s14 = smov (!%p337_p2), 33   ;;  %s1466_s15 = smov (!%p337_p2), 31  }
   0xa   : > { %s1471_s20 = smov (!%p337_p2), 63   ;;  %s1472_s21 = smov (!%p337_p2), 64  }
   0xb   : > { %v1453_v0 = vmov 0.0   ;;  %s1897_s18 = smov (!%p375_p3, %s1241_s18), 1  ;;  %vm1454_vm0 = vmmov 0   ;;  %v1455_v2 = vmov 0   ;;  %v1572_v3 = vld [vmem:[%s1885_s5] sm:$0xff]  ;;  %v384_v4 = vlaneseq }
   0xc   : > { %1326 = vmatprep.subr.mxu0 %v1453_v0  ;;  %1341 = vmatprep.subr.mxu1 %v1453_v0  ;;  %s1246_s19 = sshll.u32 %s1897_s18, 3  ;;  %v429_v14 = vld [vmem:[%s1881_s1] sm:$0xff]  ;;  %vm436_vm6 = vcmask 392192   ;;  %v1461_v15 = vmov 2   ;;  %v1462_v20 = vmov 1   ;;  %v1463_v21 = vmov 3  }
   0xd   : > { %1338 = vmatprep.mubr.msk.f32.mxu0 %vm1454_vm0, %v1453_v0  ;;  %1365 = vmatprep.mubr.msk.f32.mxu1 %vm1454_vm0, %v1453_v0  ;;  %s378_s22 = scalar_lea.vmem %s1880_s0, %s1246_s19  ;;  %v1576_v5 = vand.u32 127, %v384_v4  ;;  %v1467_v38 = vmov 4   ;;  %v572_v46 = vld [vmem:[%s1882_s2] sm:$0xff]  ;;  %vm577_vm11 = vcmask 785408   ;;  %v1468_v48 = vmov 6  }
   0xe   : > { %v1560_v1 = vld [vmem:[%s378_s22] sm:$0xff]  ;;  %1414 = vset.pattern.permute.xlu1 %v1455_v2  ;;  %1415 = vset.pattern.permute.xlu0 %v1462_v20  ;;  %v1469_v53 = vmov 5   ;;  %v1470_v54 = vmov 7   ;;  %s1473_s22 = smov 65   ;;  %vm727_vm13 = vcmask 130048  }
   0xf   : > { %424 = vrot.lane.b32.xlu0 %v1560_v1, %s1456_s23  ;;  %413 = vrot.lane.b32.xlu1 %v1560_v1, %s1457_s24  ;;  %v390_v6 = vand.u32 15, %v1576_v5  ;;  %vm403_vm2 = vcmp.ge.s32.totalorder %v1576_v5, 16  ;;  %vm543_vm8 = vcmp.ge.s32.totalorder %v1576_v5, 32  ;;  %vm685_vm14 = vcmp.ge.s32.totalorder %v1576_v5, 64  ;;  %v721_v5 = vld [vmem:[%s1883_s3] sm:$0xff] }
  0x11   : > { %vm1579_vm1 = vcmp.le.s32.totalorder %v390_v6, 14  ;;  %vm1593_vm3 = vcmp.ge.s32.totalorder %v390_v6, 1 }
  0x12   : > { %vm415_vm4 = vmand %vm403_vm2, %vm1579_vm1 }
  0x13   : > { %419 = vrot.lane.b32.xlu0 %v1560_v1, %s1458_s25  ;;  %408 = vrot.lane.b32.xlu1 %v1560_v1, %s1459_s26  ;;  %vm404_vm5 = vmand %vm403_vm2, %vm1593_vm3 }
  0x14   : > { %vm561_vm9 = vmand %vm543_vm8, %vm1579_vm1 }
  0x15   : > { %vm544_vm10 = vmand %vm543_vm8, %vm1593_vm3 }
  0x16   : > { %vm709_vm15 = vmand %vm685_vm14, %vm1579_vm1 }
  0x17   : > { %401 = vrot.lane.b32.xlu0 %v1560_v1, %s1460_s29  ;;  %433 = vperm.xlu1 %1414, %v1572_v3   ;;  %vm686_vm0 = vmand %vm685_vm14, %vm1593_vm3 }
  0x1b   : > { %1416 = vset.pattern.permute.xlu1 %v1461_v15 }
  0x1c   : > { %528 = vperm.xlu1 %1416, %v1572_v3  }
  0x20   : > { %1417 = vset.pattern.permute.xlu1 %v1463_v21 }
  0x81   : > { %v1583_v8 = vpop.permute.xlu0 %424  ;;  %v414_v9 = vpop.permute.xlu1 %413 }
  0x82   : > { %1327 = vmatpush3.msk.msra.mxu0 %vm1579_vm1, %v1583_v8  ;;  %1342 = vmatpush3.msk.msra.mxu1 %vm1579_vm1, %v1583_v8 }
  0x83   : > { %1328 = vmatprep.subr.mxu0 %v1453_v0  ;;  %1343 = vmatprep.subr.mxu1 %v1453_v0 }
  0x84   : > { %1329 = vmatpush3.msra.mxu0 %v1560_v1 }
  0x85   : > { %1330 = vmatprep.subr.mxu0 %v1453_v0  ;;  %v1600_v11 = vpop.permute.xlu0 %419  ;;  %v409_v12 = vpop.permute.xlu1 %408 }
  0x86   : > { %1331 = vmatpush3.msk.msra.mxu0 %vm1593_vm3, %v1600_v11 }
  0x87   : > { %1332 = vmatprep.subr.mxu0 %v1453_v0 }
  0x88   : > { %1333 = vmatpush3.msk.msra.mxu0 %vm415_vm4, %v414_v9  ;;  %vm841_vm4 = vcmask 523264  }
  0x89   : > { %1334 = vmatprep.subr.mxu0 %v1453_v0  ;;  %v402_v13 = vpop.permute.xlu0 %401 }
  0x8a   : > { %1335 = vmatpush3.msk.msra.mxu0 %vm403_vm2, %v409_v12 }
  0x8b   : > { %1336 = vmatprep.subr.mxu0 %v1453_v0 }
  0x8c   : > { %1337 = vmatpush3.msk.msra.mxu0 %vm404_vm5, %v402_v13  ;;  %vm963_vm5 = vcmask 195584  }
  0x8d   : > { %1339 = vmatmul.mubr.msk.f32.vlgmr.msra.gmra.mxu0 %vm436_vm6, %v429_v14  ;;  %731 = vmatprep.subr.mxu0 %v1453_v0 }
  0x92   : > { %v434_v16 = vpop.permute.xlu1 %433 }
  0x97   : > { %v529_v26 = vpop.permute.xlu1 %528 }
 0x14d   : > { %v506_v17 = vpop.f32.mrf.mxu0 }
 0x14e   : > { %v507_v18 = vadd.f32 %v506_v17, %v434_v16  ;;  %v722_v17 = vld [vmem:[%s1883_s3 + $0x8] sm:$0xff] }
 0x14f   : > { %v1340_v19 = vpop.f32.mrf.mxu0  ;;  %1281 = vmatprep.mubr.msk.f32.mxu0 %vm727_vm13, %v722_v17 }
 0x150   : > { %510 = vadd.xlane.f32.xlu0 %v507_v18 }
 0x166   : > { %523 = vperm.xlu0 %1415, %v1572_v3  }
 0x16a   : > { %1419 = vset.pattern.permute.xlu0 %v1469_v53 }
 0x1d9   : > { %v511_v22 = vpop.xlane.xlu0 %510 }
 0x1da   : > { %v513_v23 = vmul.f32 0.0078125, %v511_v22 }
 0x1dc   : > { %v514_v24 = vsub.f32 %v507_v18, %v513_v23  ;;  %v1474_v18 = vmov 8  }
 0x1de   : > { %v515_v25 = vmul.f32 %v514_v24, %v514_v24 }
 0x1e0   : > { %516 = vadd.xlane.f32.xlu1 %v515_v25 }
 0x1e1   : > { %v524_v31 = vpop.permute.xlu0 %523 }
 0x1f1   : > { %534 = vperm.xlu1 %1417, %v1572_v3  }
 0x1f5   : > { %1418 = vset.pattern.permute.xlu1 %v1467_v38 }
 0x269   : > { %v517_v27 = vpop.xlane.xlu1 %516 }
 0x26a   : > { %v518_v28 = vmul.f32 0.0078125, %v517_v27 }
 0x26c   : > { %v519_v29 = vadd.f32 1e-05, %v518_v28 }
 0x26d   : > { %v535_v34 = vpop.permute.xlu1 %534 }
 0x26e   : > { %1435 = vrsqrt.f32 %v519_v29 }
 0x27b   : > { %v1436_v30 = vpop.eup %1435 }
 0x27c   : > { %v521_v32 = vmul.f32 %v1436_v30, %v514_v24  ;;  %v1475_v30 = vmov 10  }
 0x27e   : > { %v526_v33 = vmul.f32 %v524_v31, %v521_v32 }
 0x280   : > { %v531_v35 = vadd.f32 %v529_v26, %v526_v33 }
 0x282   : > { %vm532_vm7 = vcmp.gt.f32.partialorder %v531_v35, 0.0  ;;  %v537_v36 = vmul.f32 %v535_v34, %v531_v35 }
 0x284   : > { %v1621_v37 = vsel %vm532_vm7, %v531_v35, %v537_v36  ;;  %v1476_v35 = vmov 9   ;;  %v1477_v36 = vmov 11  }
 0x285   : > { %549 = vrot.lane.b32.xlu0 %v1621_v37, %s1464_s13  ;;  %569 = vrot.lane.b32.xlu1 %v1621_v37, %s1456_s23 }
 0x289   : > { %539 = vrot.lane.b32.xlu0 %v1621_v37, %s1465_s14  ;;  %559 = vrot.lane.b32.xlu1 %v1560_v1, %s1466_s15 }
 0x28d   : > { %566 = vrot.lane.b32.xlu1 %v1621_v37, %s1458_s25 }
 0x291   : > { %557 = vrot.lane.b32.xlu1 %v1621_v37, %s1466_s15 }
 0x295   : > { %551 = vrot.lane.b32.xlu1 %v1560_v1, %s1464_s13 }
 0x299   : > { %541 = vrot.lane.b32.xlu1 %v1560_v1, %s1465_s14 }
 0x29d   : > { %574 = vperm.xlu1 %1418, %v1572_v3  }
 0x2a1   : > { %1420 = vset.pattern.permute.xlu1 %v1468_v48 }
 0x2a2   : > { %668 = vperm.xlu1 %1420, %v1572_v3  }
 0x2a6   : > { %1421 = vset.pattern.permute.xlu1 %v1470_v54 }
 0x2f7   : > { %v1634_v39 = vpop.permute.xlu1 %569  ;;  %v550_v43 = vpop.permute.xlu0 %549 }
 0x2f8   : > { %1344 = vmatpush3.msk.msra.mxu1 %vm1579_vm1, %v1634_v39 }
 0x2f9   : > { %1345 = vmatprep.subr.mxu1 %v1453_v0 }
 0x2fa   : > { %1346 = vmatpush3.msra.mxu1 %v1560_v1 }
 0x2fb   : > { %1347 = vmatprep.subr.mxu1 %v1453_v0  ;;  %v560_v40 = vpop.permute.xlu1 %559  ;;  %v540_v47 = vpop.permute.xlu0 %539 }
 0x2fc   : > { %1348 = vmatpush3.msra.mxu1 %v1621_v37 }
 0x2fd   : > { %1349 = vmatprep.subr.mxu1 %v1453_v0 }
 0x2fe   : > { %1350 = vmatpush3.msk.msra.mxu1 %vm1593_vm3, %v1600_v11 }
 0x2ff   : > { %1351 = vmatprep.subr.mxu1 %v1453_v0  ;;  %v1649_v41 = vpop.permute.xlu1 %566 }
 0x300   : > { %1352 = vmatpush3.msk.msra.mxu1 %vm1593_vm3, %v1649_v41 }
 0x301   : > { %1353 = vmatprep.subr.mxu1 %v1453_v0 }
 0x302   : > { %1354 = vmatpush3.msk.msra.mxu1 %vm561_vm9, %v560_v40 }
 0x303   : > { %1355 = vmatprep.subr.mxu1 %v1453_v0  ;;  %v558_v42 = vpop.permute.xlu1 %557 }
 0x304   : > { %1356 = vmatpush3.msk.msra.mxu1 %vm561_vm9, %v558_v42 }
 0x305   : > { %1357 = vmatprep.subr.mxu1 %v1453_v0 }
 0x307   : > { %v552_v44 = vpop.permute.xlu1 %551 }
 0x308   : > { %1358 = vmatpush3.msk.msra.mxu1 %vm543_vm8, %v552_v44 }
 0x309   : > { %1359 = vmatprep.subr.mxu1 %v1453_v0 }
 0x30a   : > { %1360 = vmatpush3.msk.msra.mxu1 %vm543_vm8, %v550_v43 }
 0x30b   : > { %1361 = vmatprep.subr.mxu1 %v1453_v0  ;;  %v542_v45 = vpop.permute.xlu1 %541 }
 0x30c   : > { %1362 = vmatpush3.msk.msra.mxu1 %vm544_vm10, %v542_v45 }
 0x30d   : > { %1363 = vmatprep.subr.mxu1 %v1453_v0 }
 0x30e   : > { %1364 = vmatpush3.msk.msra.mxu1 %vm544_vm10, %v540_v47 }
 0x30f   : > { %1366 = vmatmul.mubr.msk.f32.vlgmr.msra.gmra.mxu1 %vm577_vm11, %v572_v46  ;;  %845 = vmatprep.subr.mxu1 %v1453_v0 }
 0x310   : > { %1282 = vmatpush1.msk.msra.mxu1 %vm1593_vm3, %v1600_v11 }
 0x311   : > { %847 = vmatprep.subr.mxu1 %v1453_v0 }
 0x312   : > { %1283 = vmatpush1.msk.msra.mxu1 %vm1593_vm3, %v1649_v41 }
 0x313   : > { %849 = vmatprep.subr.mxu1 %v1453_v0 }
 0x318   : > { %v575_v49 = vpop.permute.xlu1 %574 }
 0x31d   : > { %v669_v59 = vpop.permute.xlu1 %668 }
 0x3cf   : > { %v647_v50 = vpop.f32.mrf.mxu1 }
 0x3d0   : > { %v648_v51 = vadd.f32 %v647_v50, %v575_v49 }
 0x3d1   : > { %v1367_v52 = vpop.f32.mrf.mxu1 }
 0x3d2   : > { %651 = vadd.xlane.f32.xlu0 %v648_v51 }
 0x3e8   : > { %663 = vperm.xlu0 %1419, %v1572_v3  }
 0x3ec   : > { %1423 = vset.pattern.permute.xlu0 %v1476_v35 }
 0x45b   : > { %v652_v55 = vpop.xlane.xlu0 %651 }
 0x45c   : > { %v653_v56 = vmul.f32 0.0078125, %v652_v55  ;;  %v836_v55 = vld [vmem:[%s1884_s4 + $0x8] sm:$0xff] }
 0x45d   : > { %1290 = vmatprep.mubr.msk.f32.mxu1 %vm841_vm4, %v836_v55 }
 0x45e   : > { %v654_v57 = vsub.f32 %v648_v51, %v653_v56  ;;  %v1478_v56 = vmov 12  }
 0x460   : > { %v655_v58 = vmul.f32 %v654_v57, %v654_v57 }
 0x462   : > { %656 = vadd.xlane.f32.xlu1 %v655_v58 }
 0x463   : > { %v664_v4 = vpop.permute.xlu0 %663 }
 0x473   : > { %674 = vperm.xlu1 %1421, %v1572_v3  }
 0x477   : > { %1422 = vset.pattern.permute.xlu1 %v1474_v18 }
 0x4eb   : > { %v657_v60 = vpop.xlane.xlu1 %656 }
 0x4ec   : > { %v658_v61 = vmul.f32 0.0078125, %v657_v60 }
 0x4ee   : > { %v659_v62 = vadd.f32 1e-05, %v658_v61  ;;  %v1479_v61 = vmov 13  }
 0x4ef   : > { %v675_v12 = vpop.permute.xlu1 %674 }
 0x4f0   : > { %1437 = vrsqrt.f32 %v659_v62  ;;  %v1481_v62 = vmov 15  }
 0x4fd   : > { %v1438_v63 = vpop.eup %1437 }
 0x4fe   : > { %v661_v6 = vmul.f32 %v1438_v63, %v654_v57 }
 0x500   : > { %v666_v9 = vmul.f32 %v664_v4, %v661_v6 }
 0x502   : > { %v671_v13 = vadd.f32 %v669_v59, %v666_v9 }
 0x504   : > { %vm672_vm12 = vcmp.gt.f32.partialorder %v671_v13, 0.0  ;;  %v677_v14 = vmul.f32 %v675_v12, %v671_v13 }
 0x506   : > { %v1687_v16 = vsel %vm672_vm12, %v671_v13, %v677_v14 }
 0x507   : > { %703 = vrot.lane.b32.xlu0 %v1687_v16, %s1471_s20  ;;  %718 = vrot.lane.b32.xlu1 %v1687_v16, %s1456_s23 }
 0x50b   : > { %694 = vrot.lane.b32.xlu0 %v1621_v37, %s1472_s21  ;;  %707 = vrot.lane.b32.xlu1 %v1560_v1, %s1471_s20 }
 0x50f   : > { %683 = vrot.lane.b32.xlu0 %v1560_v1, %s1473_s22  ;;  %715 = vrot.lane.b32.xlu1 %v1687_v16, %s1458_s25 }
 0x513   : > { %679 = vrot.lane.b32.xlu0 %v1687_v16, %s1473_s22  ;;  %705 = vrot.lane.b32.xlu1 %v1621_v37, %s1471_s20 }
 0x517   : > { %696 = vrot.lane.b32.xlu1 %v1560_v1, %s1472_s21 }
 0x51b   : > { %692 = vrot.lane.b32.xlu1 %v1687_v16, %s1472_s21 }
 0x51f   : > { %681 = vrot.lane.b32.xlu1 %v1621_v37, %s1473_s22 }
 0x523   : > { %724 = vperm.xlu1 %1422, %v1572_v3  }
 0x527   : > { %1424 = vset.pattern.permute.xlu1 %v1475_v30 }
 0x528   : > { %818 = vperm.xlu1 %1424, %v1572_v3  }
 0x52c   : > { %1425 = vset.pattern.permute.xlu1 %v1477_v36 }
 0x579   : > { %v1707_v19 = vpop.permute.xlu1 %718  ;;  %v704_v23 = vpop.permute.xlu0 %703 }
 0x57a   : > { %1266 = vmatpush1.msk.msra.mxu0 %vm1579_vm1, %v1707_v19 }
 0x57b   : > { %733 = vmatprep.subr.mxu0 %v1453_v0 }
 0x57c   : > { %734 = vmatpush1.msra.mxu0 %v1560_v1 }
 0x57d   : > { %735 = vmatprep.subr.mxu0 %v1453_v0  ;;  %v708_v21 = vpop.permute.xlu1 %707  ;;  %v695_v25 = vpop.permute.xlu0 %694 }
 0x57e   : > { %736 = vmatpush1.msra.mxu0 %v1621_v37 }
 0x57f   : > { %737 = vmatprep.subr.mxu0 %v1453_v0 }
 0x580   : > { %738 = vmatpush1.msra.mxu0 %v1687_v16 }
 0x581   : > { %739 = vmatprep.subr.mxu0 %v1453_v0  ;;  %v716_v22 = vpop.permute.xlu1 %715  ;;  %v684_v27 = vpop.permute.xlu0 %683 }
 0x582   : > { %1267 = vmatpush1.msk.msra.mxu0 %vm1593_vm3, %v1600_v11  ;;  %1284 = vmatpush1.msk.msra.mxu1 %vm1593_vm3, %v716_v22 }
 0x583   : > { %741 = vmatprep.subr.mxu0 %v1453_v0  ;;  %851 = vmatprep.subr.mxu1 %v1453_v0 }
 0x584   : > { %1268 = vmatpush1.msk.msra.mxu0 %vm1593_vm3, %v1649_v41 }
 0x585   : > { %743 = vmatprep.subr.mxu0 %v1453_v0  ;;  %v706_v24 = vpop.permute.xlu1 %705  ;;  %v680_v29 = vpop.permute.xlu0 %679 }
 0x586   : > { %1269 = vmatpush1.msk.msra.mxu0 %vm1593_vm3, %v716_v22 }
 0x587   : > { %745 = vmatprep.subr.mxu0 %v1453_v0 }
 0x588   : > { %1270 = vmatpush1.msk.msra.mxu0 %vm709_vm15, %v708_v21 }
 0x589   : > { %747 = vmatprep.subr.mxu0 %v1453_v0  ;;  %v697_v11 = vpop.permute.xlu1 %696 }
 0x58a   : > { %1271 = vmatpush1.msk.msra.mxu0 %vm709_vm15, %v706_v24 }
 0x58b   : > { %749 = vmatprep.subr.mxu0 %v1453_v0 }
 0x58c   : > { %1272 = vmatpush1.msk.msra.mxu0 %vm709_vm15, %v704_v23 }
 0x58d   : > { %751 = vmatprep.subr.mxu0 %v1453_v0  ;;  %v693_v26 = vpop.permute.xlu1 %692 }
 0x58e   : > { %1273 = vmatpush1.msk.msra.mxu0 %vm685_vm14, %v697_v11  ;;  %v951_v11 = vld [vmem:[%s1887_s7] sm:$0xff] }
 0x58f   : > { %753 = vmatprep.subr.mxu0 %v1453_v0 }
 0x590   : > { %1274 = vmatpush1.msk.msra.mxu0 %vm685_vm14, %v695_v25  ;;  %v952_v25 = vld [vmem:[%s1887_s7 + $0x8] sm:$0xff] }
 0x591   : > { %755 = vmatprep.subr.mxu0 %v1453_v0  ;;  %v682_v28 = vpop.permute.xlu1 %681 }
 0x592   : > { %1275 = vmatpush1.msk.msra.mxu0 %vm685_vm14, %v693_v26 }
 0x593   : > { %757 = vmatprep.subr.mxu0 %v1453_v0 }
 0x594   : > { %1276 = vmatpush1.msk.msra.mxu0 %vm686_vm0, %v684_v27 }
 0x595   : > { %759 = vmatprep.subr.mxu0 %v1453_v0 }
 0x596   : > { %1277 = vmatpush1.msk.msra.mxu0 %vm686_vm0, %v682_v28  ;;  %v950_v28 = vld [vmem:[%s1886_s6 + $0x8] sm:$0xff] }
 0x597   : > { %761 = vmatprep.subr.mxu0 %v1453_v0 }
 0x598   : > { %1278 = vmatpush1.msk.msra.mxu0 %vm686_vm0, %v680_v29 }
 0x599   : > { %791 = vmatprep.subr.mxu0 %v1453_v0 }
 0x59a   : > { %1279 = vmatpush2.msk.msra.mxu0 %vm1579_vm1, %v1583_v8 }
 0x59b   : > { %793 = vmatprep.subr.mxu0 %v1453_v0 }
 0x59c   : > { %1280 = vmatpush2.msk.msra.mxu0 %vm1579_vm1, %v1634_v39 }
 0x59d   : > { %796 = vmatmul.mubr.f32.vlgmr.msra.gmra.mxu0 %v721_v5 }
 0x59e   : > { %v725_v31 = vpop.permute.xlu1 %724 }
 0x5a3   : > { %v819_v43 = vpop.permute.xlu1 %818 }
 0x65d   : > { %v797_v32 = vpop.f32.mrf.mxu0 }
 0x65e   : > { %v798_v33 = vadd.f32 %v797_v32, %v725_v31 }
 0x65f   : > { %v799_v34 = vpop.f32.mrf.mxu0 }
 0x660   : > { %801 = vadd.xlane.f32.xlu0 %v798_v33 }
 0x676   : > { %813 = vperm.xlu0 %1423, %v1572_v3  }
 0x6e9   : > { %v802_v38 = vpop.xlane.xlu0 %801 }
 0x6ea   : > { %v803_v40 = vmul.f32 0.0078125, %v802_v38 }
 0x6ec   : > { %v804_v41 = vsub.f32 %v798_v33, %v803_v40 }
 0x6ee   : > { %v805_v42 = vmul.f32 %v804_v41, %v804_v41 }
 0x6f0   : > { %806 = vadd.xlane.f32.xlu1 %v805_v42 }
 0x6f1   : > { %v814_v48 = vpop.permute.xlu0 %813 }
 0x701   : > { %824 = vperm.xlu1 %1425, %v1572_v3  }
 0x705   : > { %1426 = vset.pattern.permute.xlu1 %v1478_v56 }
 0x779   : > { %v807_v44 = vpop.xlane.xlu1 %806 }
 0x77a   : > { %v808_v45 = vmul.f32 0.0078125, %v807_v44 }
 0x77c   : > { %v809_v46 = vadd.f32 1e-05, %v808_v45 }
 0x77d   : > { %v825_v51 = vpop.permute.xlu1 %824 }
 0x77e   : > { %1439 = vrsqrt.f32 %v809_v46 }
 0x78b   : > { %v1440_v47 = vpop.eup %1439 }
 0x78c   : > { %v811_v49 = vmul.f32 %v1440_v47, %v804_v41 }
 0x78e   : > { %v816_v50 = vmul.f32 %v814_v48, %v811_v49 }
 0x790   : > { %v821_v52 = vadd.f32 %v819_v43, %v816_v50 }
 0x792   : > { %v827_v53 = vmul.f32 %v825_v51, %v821_v52  ;;  %vm822_vm2 = vcmp.gt.f32.partialorder %v821_v52, 0.0 }
 0x794   : > { %v828_v54 = vsel %vm822_vm2, %v821_v52, %v827_v53 }
 0x795   : > { %829 = vrot.lane.b32.xlu1 %v828_v54, %s1458_s25 }
 0x799   : > { %832 = vrot.lane.b32.xlu1 %v828_v54, %s1456_s23 }
 0x79d   : > { %838 = vperm.xlu1 %1426, %v1572_v3  }
 0x7a1   : > { %1427 = vset.pattern.permute.xlu1 %v1479_v61 }
 0x807   : > { %v830_v57 = vpop.permute.xlu1 %829 }
 0x808   : > { %1285 = vmatpush1.msk.msra.mxu1 %vm1593_vm3, %v830_v57 }
 0x809   : > { %853 = vmatprep.subr.mxu1 %v1453_v0 }
 0x80a   : > { %854 = vmatpush1.msra.mxu1 %v1453_v0 }
 0x80b   : > { %855 = vmatprep.subr.mxu1 %v1453_v0  ;;  %v833_v58 = vpop.permute.xlu1 %832 }
 0x80c   : > { %856 = vmatpush1.msra.mxu1 %v1453_v0 }
 0x80d   : > { %857 = vmatprep.subr.mxu1 %v1453_v0 }
 0x80e   : > { %858 = vmatpush1.msra.mxu1 %v1453_v0 }
 0x80f   : > { %859 = vmatprep.subr.mxu1 %v1453_v0 }
 0x810   : > { %860 = vmatpush1.msra.mxu1 %v1453_v0 }
 0x811   : > { %861 = vmatprep.subr.mxu1 %v1453_v0 }
 0x812   : > { %862 = vmatpush1.msra.mxu1 %v1453_v0 }
 0x813   : > { %863 = vmatprep.subr.mxu1 %v1453_v0 }
 0x814   : > { %864 = vmatpush1.msra.mxu1 %v1453_v0 }
 0x815   : > { %865 = vmatprep.subr.mxu1 %v1453_v0 }
 0x816   : > { %866 = vmatpush1.msra.mxu1 %v1453_v0 }
 0x817   : > { %867 = vmatprep.subr.mxu1 %v1453_v0 }
 0x818   : > { %868 = vmatpush1.msra.mxu1 %v1453_v0 }
 0x819   : > { %869 = vmatprep.subr.mxu1 %v1453_v0 }
 0x81a   : > { %870 = vmatpush1.msra.mxu1 %v1453_v0 }
 0x81b   : > { %871 = vmatprep.subr.mxu1 %v1453_v0 }
 0x81c   : > { %872 = vmatpush1.msra.mxu1 %v1453_v0 }
 0x81d   : > { %873 = vmatprep.subr.mxu1 %v1453_v0 }
 0x81e   : > { %874 = vmatpush1.msra.mxu1 %v1453_v0 }
 0x81f   : > { %875 = vmatprep.subr.mxu1 %v1453_v0 }
 0x820   : > { %876 = vmatpush1.msra.mxu1 %v1453_v0 }
 0x821   : > { %893 = vmatprep.subr.mxu1 %v1453_v0 }
 0x822   : > { %1286 = vmatpush2.msk.msra.mxu1 %vm1579_vm1, %v1583_v8  ;;  %v835_v8 = vld [vmem:[%s1884_s4] sm:$0xff] }
 0x823   : > { %895 = vmatprep.subr.mxu1 %v1453_v0 }
 0x824   : > { %1287 = vmatpush2.msk.msra.mxu1 %vm1579_vm1, %v1634_v39  ;;  %v839_v39 = vpop.permute.xlu1 %838 }
 0x825   : > { %897 = vmatprep.subr.mxu1 %v1453_v0 }
 0x826   : > { %1288 = vmatpush2.msk.msra.mxu1 %vm1579_vm1, %v1707_v19  ;;  %v949_v19 = vld [vmem:[%s1886_s6] sm:$0xff] }
 0x827   : > { %899 = vmatprep.subr.mxu1 %v1453_v0  ;;  %1374 = vmatprep.mubr.msk.f32.mxu0 %vm963_vm5, %v949_v19 }
 0x828   : > { %1289 = vmatpush2.msk.msra.mxu1 %vm1579_vm1, %v833_v58 }
 0x829   : > { %901 = vmatprep.subr.mxu1 %v1453_v0 }
 0x82a   : > { %902 = vmatpush2.msra.mxu1 %v1560_v1 }
 0x82b   : > { %903 = vmatprep.subr.mxu1 %v1453_v0 }
 0x82c   : > { %904 = vmatpush2.msra.mxu1 %v1621_v37  ;;  %v1480_v37 = vmov 14  }
 0x82d   : > { %905 = vmatprep.subr.mxu1 %v1453_v0  ;;  %1428 = vset.pattern.permute.xlu0 %v1480_v37 }
 0x82e   : > { %906 = vmatpush2.msra.mxu1 %v1687_v16 }
 0x82f   : > { %907 = vmatprep.subr.mxu1 %v1453_v0 }
 0x830   : > { %908 = vmatpush2.msra.mxu1 %v828_v54 }
 0x831   : > { %910 = vmatmul.mubr.f32.vlgmr.msra.gmra.mxu1 %v835_v8 }
 0x8f1   : > { %v911_v59 = vpop.f32.mrf.mxu1 }
 0x8f2   : > { %v912_v60 = vadd.f32 %v911_v59, %v839_v39  ;;  %v1093_v59 = vld [vmem:[%s1889_s9] sm:$0x3] }
 0x8f3   : > { %v913_v1 = vpop.f32.mrf.mxu1 }
 0x8f4   : > { %915 = vadd.xlane.f32.xlu1 %v912_v60 }
 0x905   : > { %927 = vperm.xlu1 %1427, %v1572_v3  }
 0x909   : > { %1429 = vset.pattern.permute.xlu1 %v1481_v62 }
 0x90a   : > { %938 = vperm.xlu1 %1429, %v1572_v3  }
 0x90e   : > { %1430 = vset.pattern.permute.xlu1 %v1455_v2 }
 0x97d   : > { %v916_v63 = vpop.xlane.xlu1 %915 }
 0x97e   : > { %v917_v4 = vmul.f32 0.0078125, %v916_v63 }
 0x980   : > { %v918_v6 = vsub.f32 %v912_v60, %v917_v4 }
 0x981   : > { %v928_v16 = vpop.permute.xlu1 %927 }
 0x982   : > { %v919_v9 = vmul.f32 %v918_v6, %v918_v6 }
 0x984   : > { %920 = vadd.xlane.f32.xlu0 %v919_v9 }
 0x985   : > { %v939_v23 = vpop.permute.xlu1 %938 }
 0x99a   : > { %932 = vperm.xlu0 %1428, %v1572_v3  }
 0x99e   : > { %1431 = vset.pattern.permute.xlu0 %v1462_v20 }
 0xa0d   : > { %v921_v12 = vpop.xlane.xlu0 %920 }
 0xa0e   : > { %v922_v13 = vmul.f32 0.0078125, %v921_v12 }
 0xa10   : > { %v923_v14 = vadd.f32 1e-05, %v922_v13 }
 0xa12   : > { %1441 = vrsqrt.f32 %v923_v14 }
 0xa15   : > { %v933_v21 = vpop.permute.xlu0 %932 }
 0xa1f   : > { %v1442_v17 = vpop.eup %1441 }
 0xa20   : > { %v925_v18 = vmul.f32 %v1442_v17, %v918_v6 }
 0xa22   : > { %v930_v22 = vmul.f32 %v928_v16, %v925_v18 }
 0xa24   : > { %v935_v3 = vadd.f32 %v933_v21, %v930_v22 }
 0xa26   : > { %vm936_vm6 = vcmp.gt.f32.partialorder %v935_v3, 0.0  ;;  %v941_v20 = vmul.f32 %v939_v23, %v935_v3 }
 0xa28   : > { %v942_v24 = vsel %vm936_vm6, %v935_v3, %v941_v20 }
 0xa29   : > { %946 = vrot.lane.b32.xlu1 %v942_v24, %s1456_s23 }
 0xa2d   : > { %943 = vrot.lane.b32.xlu1 %v942_v24, %s1458_s25 }
 0xa31   : > { %955 = vperm.xlu1 %1430, %v951_v11  }
 0xa35   : > { %960 = vperm.xlu1 %1430, %v952_v25  }
 0xa9b   : > { %v947_v26 = vpop.permute.xlu1 %946 }
 0xa9c   : > { %1368 = vmatprep.subr.msk.mxu0 %vm1579_vm1, %v947_v26 }
 0xa9d   : > { %1369 = vmatpush3.msk.msra.mxu0 %vm1579_vm1, %v947_v26 }
 0xa9e   : > { %1370 = vmatprep.subr.mxu0 %v942_v24 }
 0xa9f   : > { %1371 = vmatpush3.msra.mxu0 %v942_v24  ;;  %v944_v27 = vpop.permute.xlu1 %943 }
 0xaa0   : > { %1372 = vmatprep.subr.msk.mxu0 %vm1593_vm3, %v944_v27 }
 0xaa1   : > { %1373 = vmatpush3.msk.msra.mxu0 %vm1593_vm3, %v944_v27 }
 0xaa2   : > { %1375 = vmatmul.mubr.msk.f32.vlgmr.msra.gmra.mxu0 %vm963_vm5, %v950_v28 }
 0xaa3   : > { %1167 = vmatprep.mubr.f32.mxu0 %v1453_v0  ;;  %v1064_v0 = vld [vmem:[%s1888_s8] sm:$0xff] }
 0xaac   : > { %v956_v29 = vpop.permute.xlu1 %955 }
 0xab0   : > { %v961_v5 = vpop.permute.xlu1 %960 }
 0xb62   : > { %v1376_v30 = vpop.f32.mrf.mxu0 }
 0xb63   : > { %v1042_v31 = vadd.f32 %v1376_v30, %v961_v5 }
 0xb64   : > { %v1036_v32 = vpop.f32.mrf.mxu0 }
 0xb65   : > { %v1037_v33 = vadd.f32 %v1036_v32, %v956_v29  ;;  %1047 = vadd.xlane.f32.xlu0 %v1042_v31 }
 0xb67   : > { %1045 = vadd.xlane.f32.xlu1 %v1037_v33 }
 0xbee   : > { %v1048_v34 = vpop.xlane.xlu0 %1047 }
 0xbf0   : > { %v1046_v35 = vpop.xlane.xlu1 %1045 }
 0xbf1   : > { %v1049_v36 = vadd.f32 %v1048_v34, %v1046_v35 }
 0xbf3   : > { %v1051_v38 = vmul.f32 0.00390625, %v1049_v36 }
 0xbf5   : > { %v1052_v40 = vsub.f32 %v1037_v33, %v1051_v38  ;;  %v1056_v41 = vsub.f32 %v1042_v31, %v1051_v38 }
 0xbf7   : > { %v1057_v10 = vmul.f32 %v1056_v41, %v1056_v41  ;;  %v1053_v42 = vmul.f32 %v1052_v40, %v1052_v40 }
 0xbf9   : > { %1058 = vadd.xlane.f32.xlu0 %v1057_v10  ;;  %1054 = vadd.xlane.f32.xlu1 %v1053_v42 }
 0xc0f   : > { %1074 = vperm.xlu0 %1431, %v1064_v0  }
 0xc13   : > { %1434 = vset.pattern.permute.xlu0 %v1455_v2 }
 0xc82   : > { %v1059_v43 = vpop.xlane.xlu0 %1058  ;;  %v1055_v44 = vpop.xlane.xlu1 %1054 }
 0xc83   : > { %v1060_v45 = vadd.f32 %v1059_v43, %v1055_v44 }
 0xc85   : > { %v1061_v46 = vmul.f32 0.00390625, %v1060_v45 }
 0xc87   : > { %v1062_v47 = vadd.f32 1e-05, %v1061_v46 }
 0xc89   : > { %1443 = vrsqrt.f32 %v1062_v47 }
 0xc8a   : > { %v1075_v51 = vpop.permute.xlu0 %1074 }
 0xc96   : > { %v1444_v48 = vpop.eup %1443 }
 0xc97   : > { %v1065_v49 = vmul.f32 %v1444_v48, %v1064_v0 }
 0xc99   : > { %1068 = vperm.xlu1 %1430, %v1065_v49  }
 0xc9d   : > { %1432 = vset.pattern.permute.xlu1 %v1461_v15  ;;  %v1094_v15 = vld [vmem:[%s1890_s10] sm:$0x3] }
 0xc9e   : > { %1082 = vperm.xlu1 %1432, %v1064_v0  }
 0xca2   : > { %1433 = vset.pattern.permute.xlu1 %v1455_v2 }
 0xd14   : > { %v1069_v50 = vpop.permute.xlu1 %1068 }
 0xd15   : > { %v1071_v52 = vmul.f32 %v1069_v50, %v1052_v40  ;;  %v1078_v53 = vmul.f32 %v1069_v50, %v1056_v41 }
 0xd17   : > { %v1077_v54 = vadd.f32 %v1075_v51, %v1071_v52  ;;  %v1079_v55 = vadd.f32 %v1078_v53, %v1075_v51 }
 0xd19   : > { %v1083_v56 = vpop.permute.xlu1 %1082  ;;  %vm1080_vm3 = vcmp.gt.f32.partialorder %v1077_v54, 0.0  ;;  %vm1087_vm7 = vcmp.gt.f32.partialorder %v1079_v55, 0.0 }
 0xd1a   : > { %v1085_v57 = vmul.f32 %v1083_v56, %v1077_v54  ;;  %v1088_v8 = vmul.f32 %v1083_v56, %v1079_v55 }
 0xd1c   : > { %v1086_v58 = vsel %vm1080_vm3, %v1077_v54, %v1085_v57  ;;  %v1089_v39 = vsel %vm1087_vm7, %v1079_v55, %v1088_v8 }
 0xd1d   : > { %1090 = vrot.lane.b32.xlu1 %v1086_v58, %s1456_s23  ;;  %s1300_s23 = sshll.u32 %s1897_s18, 2 }
 0xd1e   : > { %s383_s14 = scalar_lea.vmem %s1891_s11, %s1300_s23 }
 0xd21   : > { %1097 = vperm.xlu1 %1433, %v1094_v15  }
 0xd8f   : > { %v1091_v2 = vpop.permute.xlu1 %1090 }
 0xd90   : > { %1295 = vmatprep.subr.msk.mxu0 %vm1579_vm1, %v1091_v2 }
 0xd91   : > { %1132 = vmatpush1.msra.mxu0 %v1089_v39 }
 0xd92   : > { %1133 = vmatprep.subr.mxu0 %v1089_v39 }
 0xd93   : > { %1134 = vmatpush1.msra.mxu0 %v1086_v58 }
 0xd94   : > { %1296 = vmatmul.mubr.msk.f32.vlgmr.msra.gmra.mxu0 %vm727_vm13, %v1093_v59 }
 0xd9c   : > { %v1098_v1 = vpop.permute.xlu1 %1097 }
 0xe54   : > { %v1169_v60 = vpop.f32.mrf.mxu0 }
 0xe55   : > { %v1170_v37 = vadd.f32 %v1169_v60, %v1098_v1 }
 0xe56   : > { %v1171_v61 = vpop.f32.mrf.mxu0 }
 0xe57   : > { %v1172_v62 = vadd.f32 %v1171_v61, %v1098_v1 }
 0xe59   : > { %v1176_v7 = vcombine.low %v1170_v37, %v1172_v62 }
 0xe5b   : > { %1297 = vst.sshfl [vmem:[%s383_s14] sm:$0x33 pattern:$0x76325410] %v1176_v7 }
 0xe5c PF: > { %s21_s17 = sadd.s32 1, %s1451_s17  }
 0xe5d   : > { %p18_p4 = scmp.ge.s32.totalorder %s21_s17, 4  }
 0xe5f   :  { %20 = sbr.rel (!%p18_p4) target bundleno = 1 (0x1), region = 94 }

</bundles_post_ra>
